<compile_context>
chip_gen: v7x
topology: tpu7x:2x2x1
jax: 0.10.0
libtpu: 0.0.40
codegen_flags: <defaults>
</compile_context>

<pallas_src>
import functools

import jax
import jax.numpy as jnp
from jax import lax
from jax.experimental import pallas as pl
from jax.experimental.pallas import tpu as pltpu

N_EMBD = 64
HEAD_SIZE = 16          # head_size passed to Head(head_size)
BLOCK_SIZE = 36         # max sequence length supported by the module's tril buffer
NEG_INF = -1e30         # finite "masked" fill; exp underflows to exactly 0 in f32


def head_kernel(x_ref, a_ref, wv_ref, o_ref, *, t_real):
    Bb, Tp, C = x_ref.shape
    hs = wv_ref.shape[1]

    x3 = x_ref[...]                                     # (Bb, Tp, C) f32
    x2 = x3.reshape(Bb * Tp, C)                         # leading-dim collapse only

    # ---- scores: wei = (x @ A) @ x^T, A = (Wq*sqrt(C)) @ Wk^T folded host-side ----
    s = jnp.dot(x2, a_ref[...], preferred_element_type=jnp.float32)        # (Bb*Tp, C)
    s = s.reshape(Bb, Tp, C)
    wei = jnp.einsum("btc,bsc->bts", s, x3, preferred_element_type=jnp.float32)

    # ---- value projection in bf16 (f32 accumulation) ----
    v = jnp.dot(x2.astype(jnp.bfloat16), wv_ref[...],
                preferred_element_type=jnp.float32).reshape(Bb, Tp, hs)

    # ---- causal (+ padded-column) mask, built once, one select ----
    row = lax.broadcasted_iota(jnp.int32, (Tp, Tp), 0)
    col = lax.broadcasted_iota(jnp.int32, (Tp, Tp), 1)
    mask = (col <= row) & (col < t_real)                # tril[:T,:T] plus pad mask
    wei = jnp.where(mask[None], wei, jnp.float32(NEG_INF))

    # ---- explicit softmax; divide via approximate reciprocal on the EUP ----
    m = jnp.max(wei, axis=-1, keepdims=True)
    p = jnp.exp(wei - m)
    l = jnp.sum(p, axis=-1, keepdims=True)              # >= 1 (max entry contributes 1)
    p = p * pl.reciprocal(l, approx=True)
    # dropout(p=0.3) is identity in eval mode.

    out = jnp.einsum("bts,bsd->btd", p.astype(jnp.bfloat16), v.astype(jnp.bfloat16),
                     preferred_element_type=jnp.float32)                   # (Bb, Tp, hs)
    o_ref[...] = out.astype(o_ref.dtype)


def _tensorcores_per_chip():
    """2 TensorCores on v7x (and v4/v5p megacore-style parts), 1 on v5e/v6e."""
    try:
        kind = jax.devices()[0].device_kind.lower()
    except Exception:
        return 1
    if "v7" in kind or "v4" in kind or "v5p" in kind:
        return 2
    return 1


def _choose_block_b(B, Tp, C, hs, n_cores):
    """One batch block per TensorCore, capped by a conservative VMEM budget."""
    bytes_per_row = Tp * (2 * C * 4        # x block, double-buffered
                          + 2 * hs * 4     # out block, double-buffered
                          + C * 4          # s = x @ A intermediate
                          + 3 * Tp * 4     # wei / exp / scratch intermediates
                          + hs * 2 + hs * 4)
    budget = 10 * 1024 * 1024              # well under every generation's scoped VMEM
    cap = max(1, budget // bytes_per_row)
    return max(1, min(pl.cdiv(B, n_cores), cap, 512))


def prepare_head_params(wq, wk, wv, n_embd=N_EMBD):
    """One-time parameter prep, hoisted off the forward/launch path.

    Folds the module's `* C**0.5` logit scale and the Wq/Wk product into one (C, C)
    matrix A (so the score matmul has contraction depth C instead of head_size) and
    stores Wv in bf16 for the value path.
    """
    scale = jnp.float32(n_embd) ** 0.5
    a = (wq.astype(jnp.float32) * scale) @ wk.astype(jnp.float32).T      # (C, C)
    return a, wv.astype(jnp.bfloat16)


def head_forward(x, a, wv, *, block_b=None):
    """x: (B,T,C) f32; a: (C,C) f32 = (Wq*sqrt(C)) @ Wk^T; wv: (C,hs) bf16."""
    B, T, C = x.shape
    assert C == N_EMBD and 1 <= T <= BLOCK_SIZE
    hs = wv.shape[1]

    # Pad sequence to a sublane multiple; padded cols masked, padded rows sliced off.
    Tp = ((T + 7) // 8) * 8
    if Tp != T:
        x = jnp.pad(x, ((0, 0), (0, Tp - T), (0, 0)))

    Bb = _choose_block_b(B, Tp, C, hs, _tensorcores_per_chip()) if block_b is None else block_b
    steps = pl.cdiv(B, Bb)
    Bp = steps * Bb
    if Bp != B:                                           # pad batch instead of requiring Bb | B
        x = jnp.pad(x, ((0, Bp - B), (0, 0), (0, 0)))

    out = pl.pallas_call(
        functools.partial(head_kernel, t_real=T),
        out_shape=jax.ShapeDtypeStruct((Bp, Tp, hs), jnp.float32),
        grid_spec=pltpu.PrefetchScalarGridSpec(
            num_scalar_prefetch=0,
            grid=(steps,),
            in_specs=[
                pl.BlockSpec((Bb, Tp, C), lambda b: (b, 0, 0)),
                pl.BlockSpec((C, C), lambda b: (0, 0)),
                pl.BlockSpec((C, hs), lambda b: (0, 0)),
            ],
            out_specs=pl.BlockSpec((Bb, Tp, hs), lambda b: (b, 0, 0)),
        ),
        compiler_params=pltpu.CompilerParams(
            dimension_semantics=("parallel",),
            vmem_limit_bytes=32 * 1024 * 1024,
        ),
    )(x.astype(jnp.float32), a, wv)

    return out[:B, :T, :]


def head_reference(x, wq, wk, wv):
    """Pure-JAX reference of Head.forward (eval mode)."""
    B, T, C = x.shape
    q, k, v = x @ wq, x @ wk, x @ wv
    wei = jnp.einsum("btd,bsd->bts", q, k) * (C ** 0.5)
    tril = jnp.tril(jnp.ones((T, T), dtype=bool))
    wei = jnp.where(tril[None], wei, -jnp.inf)
    wei = jax.nn.softmax(wei, axis=-1)
    return jnp.einsum("bts,bsd->btd", wei, v)


if __name__ == "__main__":
    key = jax.random.PRNGKey(0)
    kx, kq, kk, kv = jax.random.split(key, 4)

    B, T = 8, 36                      # small demo shapes (T = block_size = 36 exercises padding)
    f32 = jnp.float32
    x = jax.random.normal(kx, (B, T, N_EMBD), f32)
    init = lambda k: jax.random.normal(k, (N_EMBD, HEAD_SIZE), f32) / jnp.sqrt(f32(N_EMBD))
    wq, wk, wv = init(kq), init(kk), init(kv)

    a, wv_prepped = prepare_head_params(wq, wk, wv)   # one-time param prep (off launch path)
    out = head_forward(x, a, wv_prepped)
    out = jax.block_until_ready(out)

    ref = head_reference(x, wq, wk, wv)
    assert out.shape == (B, T, HEAD_SIZE)
    assert jnp.allclose(out, ref, rtol=2e-2, atol=2e-2), "mismatch vs pure-JAX reference"
    print("KERNEL_OK")
</pallas_src>

<mosaic_0001>
module attributes {stable_mosaic.version = 11 : i64} {
  func.func @head_kernel(%arg0: i32, %arg1: memref<8x40x64xf32, #tpu.memory_space<vmem>>, %arg2: memref<64x64xf32, #tpu.memory_space<vmem>>, %arg3: memref<64x16xbf16, #tpu.memory_space<vmem>>, %arg4: memref<8x40x16xf32, #tpu.memory_space<vmem>>) attributes {dimension_semantics = [#tpu.dimension_semantics<parallel>], iteration_bounds = array<i64: 1>, scalar_prefetch = 0 : i64, scratch_operands = 0 : i64, tpu.core_type = #tpu.core_type<tc>, window_params = [{transform_indices = @transform_0, window_bounds = array<i64: 8, 40, 64>}, {pipeline_mode = #tpu.pipeline_mode<synchronous>, transform_indices = @transform_1, window_bounds = array<i64: 64, 64>}, {pipeline_mode = #tpu.pipeline_mode<synchronous>, transform_indices = @transform_2, window_bounds = array<i64: 64, 16>}, {transform_indices = @transform_3, window_bounds = array<i64: 8, 40, 16>}]} {
    %c0 = arith.constant 0 : index
    %c0_0 = arith.constant 0 : index
    %c0_1 = arith.constant 0 : index
    %0 = vector.load %arg1[%c0, %c0_0, %c0_1] : memref<8x40x64xf32, #tpu.memory_space<vmem>>, vector<8x40x64xf32>
    %1 = vector.shape_cast %0 : vector<8x40x64xf32> to vector<320x64xf32>
    %c0_2 = arith.constant 0 : index
    %c0_3 = arith.constant 0 : index
    %2 = vector.load %arg2[%c0_2, %c0_3] : memref<64x64xf32, #tpu.memory_space<vmem>>, vector<64x64xf32>
    %cst = arith.constant dense<0.000000e+00> : vector<320x64xf32>
    %3 = tpu.matmul %1, %2, %cst {dimension_numbers = #tpu.dot_dimension_numbers<[1], [0], [0], [1], [0, 0, 1, 1], [], []>} : vector<320x64xf32>, vector<64x64xf32>, vector<320x64xf32> -> vector<320x64xf32>
    %4 = vector.shape_cast %3 : vector<320x64xf32> to vector<8x40x64xf32>
    "tpu.trace_start"() <{level = 10 : i32, message = "btc,bsc->bts"}> : () -> ()
    %cst_4 = arith.constant dense<0.000000e+00> : vector<8x40x40xf32>
    %5 = tpu.matmul %4, %0, %cst_4 {dimension_numbers = #tpu.dot_dimension_numbers<[2], [2], [1], [1], [0, 0, 0, 1, 1, 1], [0], [0]>} : vector<8x40x64xf32>, vector<8x40x64xf32>, vector<8x40x40xf32> -> vector<8x40x40xf32>
    "tpu.trace_stop"() : () -> ()
    %6 = arith.truncf %1 : vector<320x64xf32> to vector<320x64xbf16>
    %c0_5 = arith.constant 0 : index
    %c0_6 = arith.constant 0 : index
    %7 = vector.load %arg3[%c0_5, %c0_6] : memref<64x16xbf16, #tpu.memory_space<vmem>>, vector<64x16xbf16>
    %cst_7 = arith.constant dense<0.000000e+00> : vector<320x16xf32>
    %8 = tpu.matmul %6, %7, %cst_7 {dimension_numbers = #tpu.dot_dimension_numbers<[1], [0], [0], [1], [0, 0, 1, 1], [], []>} : vector<320x64xbf16>, vector<64x16xbf16>, vector<320x16xf32> -> vector<320x16xf32>
    %9 = vector.shape_cast %8 : vector<320x16xf32> to vector<8x40x16xf32>
    %10 = tpu.iota {dimensions = array<i32: 0>} : vector<40x40xi32>
    %11 = tpu.iota {dimensions = array<i32: 1>} : vector<40x40xi32>
    %12 = arith.cmpi sle, %11, %10 : vector<40x40xi32>
    %c36_i32 = arith.constant 36 : i32
    %13 = vector.broadcast %c36_i32 : i32 to vector<40x40xi32>
    %14 = arith.cmpi slt, %11, %13 : vector<40x40xi32>
    %15 = arith.andi %12, %14 : vector<40x40xi1>
    %16 = vector.shape_cast %15 : vector<40x40xi1> to vector<1x40x40xi1>
    %cst_8 = arith.constant -1.000000e+30 : f32
    %17 = vector.shape_cast %16 : vector<1x40x40xi1> to vector<1x40x40xi1>
    %18 = vector.broadcast %17 : vector<1x40x40xi1> to vector<8x40x40xi1>
    %19 = vector.broadcast %cst_8 : f32 to vector<8x40x40xf32>
    %20 = arith.select %18, %5, %19 : vector<8x40x40xi1>, vector<8x40x40xf32>
    %cst_9 = arith.constant dense<0xFF800000> : vector<8x40xf32>
    %21 = vector.multi_reduction <maximumf>, %20, %cst_9 [2] : vector<8x40x40xf32> to vector<8x40xf32>
    %22 = vector.shape_cast %21 : vector<8x40xf32> to vector<8x40x1xf32>
    %23 = vector.broadcast %22 : vector<8x40x1xf32> to vector<8x40x40xf32>
    %24 = arith.subf %20, %23 : vector<8x40x40xf32>
    %25 = math.exp %24 : vector<8x40x40xf32>
    %cst_10 = arith.constant dense<0.000000e+00> : vector<8x40xf32>
    %26 = vector.multi_reduction <add>, %25, %cst_10 [2] : vector<8x40x40xf32> to vector<8x40xf32>
    %27 = vector.shape_cast %26 : vector<8x40xf32> to vector<8x40x1xf32>
    %28 = tpu.reciprocal %27 {approx = true} : vector<8x40x1xf32> -> vector<8x40x1xf32>
    %29 = vector.broadcast %28 : vector<8x40x1xf32> to vector<8x40x40xf32>
    %30 = arith.mulf %25, %29 : vector<8x40x40xf32>
    %31 = arith.truncf %30 : vector<8x40x40xf32> to vector<8x40x40xbf16>
    %32 = arith.truncf %9 : vector<8x40x16xf32> to vector<8x40x16xbf16>
    "tpu.trace_start"() <{level = 10 : i32, message = "bts,bsd->btd"}> : () -> ()
    %cst_11 = arith.constant dense<0.000000e+00> : vector<8x40x16xf32>
    %33 = tpu.matmul %31, %32, %cst_11 {dimension_numbers = #tpu.dot_dimension_numbers<[2], [1], [1], [2], [0, 0, 0, 1, 1, 2], [0], [0]>} : vector<8x40x40xbf16>, vector<8x40x16xbf16>, vector<8x40x16xf32> -> vector<8x40x16xf32>
    "tpu.trace_stop"() : () -> ()
    %c0_12 = arith.constant 0 : index
    %c0_13 = arith.constant 0 : index
    %c0_14 = arith.constant 0 : index
    %34 = vector.load %arg4[%c0_12, %c0_13, %c0_14] : memref<8x40x16xf32, #tpu.memory_space<vmem>>, vector<8x40x16xf32>
    tpu.vector_store %arg4[%c0_12, %c0_13, %c0_14], %33 {strides = array<i32>} : memref<8x40x16xf32, #tpu.memory_space<vmem>>, vector<8x40x16xf32>,
    return
  }
  func.func @transform_0(%arg0: i32) -> (i32, i32, i32) {
    %c0_i32 = arith.constant 0 : i32
    %c0_i32_0 = arith.constant 0 : i32
    %c0_i32_1 = arith.constant 0 : i32
    return %arg0, %c0_i32, %c0_i32_0 : i32, i32, i32
  }
  func.func @transform_1(%arg0: i32) -> (i32, i32) {
    %c0_i32 = arith.constant 0 : i32
    %c0_i32_0 = arith.constant 0 : i32
    %c0_i32_1 = arith.constant 0 : i32
    return %c0_i32, %c0_i32_0 : i32, i32
  }
  func.func @transform_2(%arg0: i32) -> (i32, i32) {
    %c0_i32 = arith.constant 0 : i32
    %c0_i32_0 = arith.constant 0 : i32
    %c0_i32_1 = arith.constant 0 : i32
    return %c0_i32, %c0_i32_0 : i32, i32
  }
  func.func @transform_3(%arg0: i32) -> (i32, i32, i32) {
    %c0_i32 = arith.constant 0 : i32
    %c0_i32_0 = arith.constant 0 : i32
    %c0_i32_1 = arith.constant 0 : i32
    return %arg0, %c0_i32, %c0_i32_0 : i32, i32, i32
  }
}

</mosaic_0001>

<bundles_post_ra>
// kernel: tpu_custom_call.1
= control target key start
LH: loop header
LB: loop body
LE: loop exit
PB: predicated region body
PF: predicated region fallthrough
CT: control target
= control target key end

     0   :  { %8 = vsyncpa [#allocation3], 0  ;;  %s5398_s0 = inlined_call_operand.hbm [shape: f32[8,40,64], index: 0, kind: input, shape index: {}]   ;;  %s5399_s1 = inlined_call_operand.hbm [shape: f32[64,64], index: 1, kind: input, shape index: {}]   ;;  %s5400_s2 = inlined_call_operand.vmem [shape: bf16[64,16], index: 2, kind: input, shape index: {}]   ;;  %s5401_s3 = inlined_call_operand.vmem [shape: f32[8,40,16], index: 3, kind: output, shape index: {}]  }
   0x1   :  { %9 = vsyncpa [#allocation5], 0  ;;  %s3913_s12 = smov [#allocation2]   ;;  %s3865_s16 = scalar_lea.hbm %s5398_s0, 5120 }
   0x2   :  { %s15_s13 = sshll.u32 %s3913_s12, 4  ;;  %p3866_p0 = scmp.ne.s32.totalorder %s5398_s0, %s3865_s16  ;;  %s16_s13 = int_to_ptr.vmem [resolvable:$true] %s15_s13 }
   0x3   :  { %p3869_p1 = scmp.lt.u32.totalorder %s3865_s16, %s5398_s0 }
   0x5   :  { %p3871_p2 = pnand %p3869_p1, %p3866_p0 }
   0x7   :  { %3874 = shalt.err (!%p3871_p2)
}
   0x8   :  { %s3875_s21 = scalar_lea.vmem %s16_s13, 5120  ;;  %p3880_p4 = scmp.lt.s32.totalorder %s16_s13, %s16_s13 }
   0x9   :  { %p3876_p3 = scmp.ne.s32.totalorder %s16_s13, %s3875_s21  ;;  %p3881_p5 = scmp.lt.s32.totalorder %s3875_s21, %s3875_s21 }
   0xb   :  { %p3882_p6 = por %p3881_p5, %p3880_p4 }
   0xd   :  { %p3883_p7 = pnand %p3882_p6, %p3876_p3 }
   0xf   :  { %3886 = shalt.err (!%p3883_p7)
}
  0x10   :  { %s3914_s22 = smov 128   ;;  %s3915_s23 = smov 8  }
  0x11   :  { %21 = dma.hbm_to_vmem [thread:$0]  %s5398_s0, 5120, %s16_s13, [#allocation3], %s3914_s22, %s3914_s22, %s3915_s23  }
  0x12   :  { %s3916_s26 = smov [#allocation4]   ;;  %s3887_s30 = scalar_lea.hbm %s5399_s1, 1024 }
  0x13   :  { %s27_s27 = sshll.u32 %s3916_s26, 4  ;;  %p3888_p8 = scmp.ne.s32.totalorder %s5399_s1, %s3887_s30  ;;  %s28_s27 = int_to_ptr.vmem [resolvable:$true] %s27_s27 }
  0x14   :  { %p3891_p9 = scmp.lt.u32.totalorder %s3887_s30, %s5399_s1 }
  0x16   :  { %p3893_p10 = pnand %p3891_p9, %p3888_p8 }
  0x18   :  { %3896 = shalt.err (!%p3893_p10)
}
  0x19   :  { %s3897_s8 = scalar_lea.vmem %s28_s27, 1024  ;;  %p3902_p12 = scmp.lt.s32.totalorder %s28_s27, %s28_s27 }
  0x1a   :  { %p3898_p11 = scmp.ne.s32.totalorder %s28_s27, %s3897_s8  ;;  %p3903_p13 = scmp.lt.s32.totalorder %s3897_s8, %s3897_s8 }
  0x1c   :  { %p3904_p0 = por %p3903_p13, %p3902_p12 }
  0x1e   :  { %p3905_p1 = pnand %p3904_p0, %p3898_p11 }
  0x20   :  { %3908 = shalt.err (!%p3905_p1)
}
  0x21   :  { %33 = dma.hbm_to_vmem [thread:$0]  %s5399_s1, 1024, %s28_s27, [#allocation5], %s3914_s22, %s3914_s22, %s3915_s23  }
  0x22   :  { %3909 = dma.done.wait [#allocation3], 5120  }
  0x23   :  { %3910 = vsyncadd [#allocation3], 4294962176 }
  0x24   :  { %3911 = dma.done.wait [#allocation5], 1024  }
  0x25   :  { %3912 = vsyncadd [#allocation5], 4294966272  ;;  %v3917_v0 = vmov 0.0|0.0   ;;  %v83_v1 = vld [vmem:[#allocation4] sm:$0xff]  ;;  %v84_v2 = vld [vmem:[#allocation4 + $0x8] sm:$0xff]  ;;  %vm91_vm0 = vcmask 523264  }
  0x26   :  { %3624 = vmatprep.subr.bf16.mxu1 %v3917_v0  ;;  %v85_v3 = vld [vmem:[#allocation4 + $0x10] sm:$0xff]  ;;  %v3608_v4 = vpack.c.bf16 %v84_v2, %v83_v1  ;;  %v86_v5 = vld [vmem:[#allocation4 + $0x18] sm:$0xff]  ;;  %v87_v7 = vld [vmem:[#allocation4 + $0x20] sm:$0xff]  ;;  %v5402_v51 = vmov 0.0   ;;  %vm3919_vm2 = vmmov 0   ;;  %vm1691_vm7 = vcmask 326656  }
  0x27   :  { %v3612_v6 = vpack.c.bf16 %v86_v5, %v85_v3  ;;  %v88_v8 = vld [vmem:[#allocation4 + $0x28] sm:$0xff]  ;;  %v43_v9 = vld [vmem:[#allocation2] sm:$0xff]  ;;  %vm3968_vm1 = vmpackc.low %vm91_vm0, %vm91_vm0  ;;  %3226 = vmatprep.mubr.msk.f32.mxu1 %vm3919_vm2, %v5402_v51  ;;  %vm2189_vm15 = vcmask 1043456  }
  0x28   :  { %3609 = vmatprep.subr.bf16.mxu0 %v3608_v4  ;;  %v44_v10 = vld [vmem:[#allocation2 + $0x8] sm:$0xff]  ;;  %3156 = vmatprep.mubr.msk.f32.mxu0 %vm91_vm0, %v43_v9  ;;  %v3974_v13 = vld [vmem:[#allocation2 + $0x20] sm:$0xff]  ;;  %v3978_v15 = vld [vmem:[#allocation2 + $0x30] sm:$0xff]  ;;  %v3616_v16 = vpack.c.bf16 %v88_v8, %v87_v7 }
  0x29   :  { %3611 = vmatpush3.bf16.msra.mxu0 %v3608_v4  ;;  %v3972_v12 = vpack.c.bf16 %v44_v10, %v43_v9  ;;  %v3976_v14 = vld [vmem:[#allocation2 + $0x28] sm:$0xff]  ;;  %v89_v17 = vld [vmem:[#allocation4 + $0x30] sm:$0xff]  ;;  %v3984_v20 = vld [vmem:[#allocation2 + $0x38] sm:$0xff] }
  0x2a   :  { %3613 = vmatprep.subr.bf16.mxu0 %v3612_v6  ;;  %v1319_v18 = vpack.c.bf16 %v3976_v14, %v3974_v13  ;;  %v3633_v19 = vpack.c.bf16 %v3978_v15, %v3976_v14  ;;  %v3986_v21 = vld [vmem:[#allocation2 + $0x40] sm:$0xff]  ;;  %v90_v22 = vld [vmem:[#allocation4 + $0x38] sm:$0xff]  ;;  %v1320_v23 = vpack.c.bf16 %v3984_v20, %v3978_v15  ;;  %v53_v25 = vld [vmem:[#allocation2 + $0x50] sm:$0xff] }
  0x2b   :  { %v3637_v24 = vpack.c.bf16 %v3986_v21, %v3984_v20  ;;  %v54_v26 = vld [vmem:[#allocation2 + $0x58] sm:$0xff]  ;;  %3627 = vmatpush3.bf16.xpose.msk.msra.mxu1 %vm3968_vm1, %v3972_v12  ;;  %v55_v28 = vld [vmem:[#allocation2 + $0x60] sm:$0xff]  ;;  %v56_v29 = vld [vmem:[#allocation2 + $0x68] sm:$0xff]  ;;  %v3620_v35 = vpack.c.bf16 %v90_v22, %v89_v17 }
  0x2c   :  { %v3995_v27 = vpack.c.bf16 %v54_v26, %v53_v25  ;;  %v3997_v30 = vld [vmem:[#allocation2 + $0x78] sm:$0xff]  ;;  %3628 = vmatprep.subr.bf16.mxu1 %v3917_v0  ;;  %v4000_v31 = vpack.c.bf16 %v56_v29, %v55_v28  ;;  %v4002_v32 = vld [vmem:[#allocation2 + $0x80] sm:$0xff]  ;;  %v4004_v33 = vld [vmem:[#allocation2 + $0x88] sm:$0xff] }
  0x2d   :  { %3615 = vmatpush3.bf16.msra.mxu0 %v3612_v6  ;;  %v4006_v34 = vld [vmem:[#allocation2 + $0x90] sm:$0xff]  ;;  %v46_v37 = vld [vmem:[#allocation2 + $0x18] sm:$0xff]  ;;  %v3649_v38 = vpack.c.bf16 %v4002_v32, %v3997_v30  ;;  %v1325_v39 = vpack.c.bf16 %v4004_v33, %v4002_v32  ;;  %v4016_v42 = vld [vmem:[#allocation2 + $0xc0] sm:$0xff] }
  0x2e   :  { %3617 = vmatprep.subr.bf16.mxu0 %v3616_v16  ;;  %v45_v36 = vld [vmem:[#allocation2 + $0x10] sm:$0xff]  ;;  %v3653_v40 = vpack.c.bf16 %v4006_v34, %v4004_v33  ;;  %v4018_v43 = vld [vmem:[#allocation2 + $0xc8] sm:$0xff]  ;;  %v4022_v45 = vld [vmem:[#allocation2 + $0xd8] sm:$0xff] }
  0x2f   :  { %v4014_v41 = vpack.c.bf16 %v46_v37, %v45_v36  ;;  %v4020_v44 = vld [vmem:[#allocation2 + $0xd0] sm:$0xff]  ;;  %v1329_v46 = vpack.c.bf16 %v4018_v43, %v4016_v42  ;;  %v4030_v49 = vld [vmem:[#allocation2 + $0xe0] sm:$0xff]  ;;  %v64_v53 = vld [vmem:[#allocation2 + $0xa8] sm:$0xff] }
  0x30   :  { %v3665_v47 = vpack.c.bf16 %v4020_v44, %v4018_v43  ;;  %v1330_v48 = vpack.c.bf16 %v4022_v45, %v4020_v44  ;;  %v3669_v50 = vpack.c.bf16 %v4030_v49, %v4022_v45  ;;  %v63_v52 = vld [vmem:[#allocation2 + $0xa0] sm:$0xff]  ;;  %v65_v55 = vld [vmem:[#allocation2 + $0xb0] sm:$0xff]  ;;  %v66_v56 = vld [vmem:[#allocation2 + $0xb8] sm:$0xff] }
  0x31   :  { %3619 = vmatpush3.bf16.msra.mxu0 %v3616_v16  ;;  %v4041_v54 = vpack.c.bf16 %v64_v53, %v63_v52  ;;  %v4057_v57 = vpack.c.bf16 %v66_v56, %v65_v55  ;;  %v4063_v58 = vld [vmem:[#allocation2 + $0x48] sm:$0xff]  ;;  %v4074_v59 = vld [vmem:[#allocation2 + $0x70] sm:$0xff]  ;;  %v4090_v60 = vld [vmem:[#allocation2 + $0x98] sm:$0xff] }
  0x32   :  { %3621 = vmatprep.subr.bf16.mxu0 %v3620_v35  ;;  %v4108_v61 = vld [vmem:[#allocation2 + $0xe8] sm:$0xff]  ;;  %v4110_v62 = vld [vmem:[#allocation2 + $0xf0] sm:$0xff]  ;;  %v4116_v63 = vld [vmem:[#allocation2 + $0xf8] sm:$0xff] }
  0x33   :  { %3631 = vmatpush3.bf16.xpose.msk.msra.mxu1 %vm3968_vm1, %v4014_v41  ;;  %v4118_v1 = vld [vmem:[#allocation2 + $0x100] sm:$0xff]  ;;  %v4124_v2 = vld [vmem:[#allocation2 + $0x108] sm:$0xff]  ;;  %v4126_v3 = vld [vmem:[#allocation2 + $0x110] sm:$0xff] }
  0x34   :  { %3224 = vmatprep.subr.mxu1 %v5402_v51  ;;  %v4132_v4 = vld [vmem:[#allocation2 + $0x118] sm:$0xff]  ;;  %v4134_v5 = vld [vmem:[#allocation2 + $0x120] sm:$0xff]  ;;  %v4140_v6 = vld [vmem:[#allocation2 + $0x128] sm:$0xff] }
  0x35   :  { %3623 = vmatpush3.bf16.msra.mxu0 %v3620_v35  ;;  %v4142_v7 = vld [vmem:[#allocation2 + $0x130] sm:$0xff]  ;;  %v4148_v8 = vld [vmem:[#allocation2 + $0x138] sm:$0xff]  ;;  %v3702_v11 = vld [vmem:[%s5400_s2 + $0x8] sm:$0xff]  }
  0x36   :  { %3656 = vmatprep.subr.bf16.mxu0 %v3917_v0 }
  0x38   :  { %3157 = vmatmul.mubr.msk.f32.vlgmr.msra.gmra.mrb[0].mxu0 %vm91_vm0, %v44_v10 }
  0x39   :  { %3159 = vmatprep.mubr.msk.f32.mxu0 %vm91_vm0, %v45_v36 }
  0x3b   :  { %3225 = vmatpush3.xpose.msk.msra.mxu1 %vm91_vm0, %v3974_v13 }
  0x3c   :  { %3160 = vmatmul.mubr.msk.f32.gmra.mrb[2].mxu0 %vm91_vm0, %v46_v37  ;;  %3632 = vmatprep.subr.bf16.mxu1 %v3917_v0 }
  0x3d   :  { %3162 = vmatprep.mubr.msk.f32.mxu0 %vm91_vm0, %v3974_v13  ;;  %v1324_v13 = vpack.c.bf16 %v3997_v30, %v4074_v59 }
  0x3e   :  { %3659 = vmatpush3.bf16.xpose.msk.msra.mxu0 %vm3968_vm1, %v4041_v54 }
  0x3f   :  { %3660 = vmatprep.subr.bf16.mxu0 %v3917_v0 }
  0x40   :  { %3163 = vmatmul.mubr.msk.f32.gmra.mrb[4].mxu0 %vm91_vm0, %v3976_v14 }
  0x41   :  { %3165 = vmatprep.mubr.msk.f32.mxu0 %vm91_vm0, %v3978_v15 }
  0x44   :  { %3166 = vmatmul.mubr.msk.f32.gmra.mrb[6].mxu0 %vm91_vm0, %v3984_v20 }
  0x45   :  { %3168 = vmatprep.mubr.msk.f32.mxu0 %vm91_vm0, %v3986_v21 }
  0x46   :  { %3663 = vmatpush3.bf16.xpose.msk.msra.mxu0 %vm3968_vm1, %v4057_v57 }
  0x47   :  { %3324 = vmatprep.subr.mxu0 %v5402_v51 }
  0x48   :  { %3169 = vmatmul.mubr.msk.f32.gmra.mrb[8].mxu0 %vm91_vm0, %v4063_v58 }
  0x49   :  { %3171 = vmatprep.mubr.msk.f32.mxu0 %vm91_vm0, %v53_v25 }
  0x4c   :  { %3172 = vmatmul.mubr.msk.f32.gmra.mrb[10].mxu0 %vm91_vm0, %v54_v26 }
  0x4d   :  { %3174 = vmatprep.mubr.msk.f32.mxu0 %vm91_vm0, %v55_v28 }
  0x4e   :  { %3325 = vmatpush3.xpose.msk.msra.mxu0 %vm91_vm0, %v4016_v42 }
  0x4f   :  { %3672 = vmatprep.subr.bf16.mxu0 %v3917_v0 }
  0x50   :  { %3175 = vmatmul.mubr.msk.f32.gmra.mrb[12].mxu0 %vm91_vm0, %v56_v29 }
  0x51   :  { %3177 = vmatprep.mubr.msk.f32.mxu0 %vm91_vm0, %v4074_v59 }
  0x54   :  { %3178 = vmatmul.mubr.msk.f32.gmra.mrb[14].mxu0 %vm91_vm0, %v3997_v30 }
  0x55   :  { %3180 = vmatprep.mubr.msk.f32.mxu0 %vm91_vm0, %v4002_v32 }
  0x58   :  { %3181 = vmatmul.mubr.msk.f32.gmra.mrb[16].mxu0 %vm91_vm0, %v4004_v33 }
  0x59   :  { %3183 = vmatprep.mubr.msk.f32.mxu0 %vm91_vm0, %v4006_v34 }
  0x5c   :  { %3184 = vmatmul.mubr.msk.f32.gmra.mrb[18].mxu0 %vm91_vm0, %v4090_v60 }
  0x5d   :  { %3186 = vmatprep.mubr.msk.f32.mxu0 %vm91_vm0, %v63_v52 }
  0x60   :  { %3187 = vmatmul.mubr.msk.f32.gmra.mrb[20].mxu0 %vm91_vm0, %v64_v53 }
  0x61   :  { %3189 = vmatprep.mubr.msk.f32.mxu0 %vm91_vm0, %v65_v55 }
  0x64   :  { %3190 = vmatmul.mubr.msk.f32.gmra.mrb[22].mxu0 %vm91_vm0, %v66_v56 }
  0x65   :  { %3192 = vmatprep.mubr.msk.f32.mxu0 %vm91_vm0, %v4016_v42 }
  0x68   :  { %3193 = vmatmul.mubr.msk.f32.gmra.mrb[24].mxu0 %vm91_vm0, %v4018_v43 }
  0x69   :  { %3195 = vmatprep.mubr.msk.f32.mxu0 %vm91_vm0, %v4020_v44 }
  0x6c   :  { %3196 = vmatmul.mubr.msk.f32.gmra.mrb[26].mxu0 %vm91_vm0, %v4022_v45 }
  0x6d   :  { %3198 = vmatprep.mubr.msk.f32.mxu0 %vm91_vm0, %v4030_v49 }
  0x70   :  { %3199 = vmatmul.mubr.msk.f32.gmra.mrb[28].mxu0 %vm91_vm0, %v4108_v61 }
  0x71   :  { %3201 = vmatprep.mubr.msk.f32.mxu0 %vm91_vm0, %v4110_v62 }
  0x74   :  { %3202 = vmatmul.mubr.msk.f32.gmra.mrb[30].mxu0 %vm91_vm0, %v4116_v63 }
  0x75   :  { %3204 = vmatprep.mubr.msk.f32.mxu0 %vm91_vm0, %v4118_v1 }
  0x78   :  { %3205 = vmatmul.mubr.msk.f32.gmra.mrb[32].mxu0 %vm91_vm0, %v4124_v2 }
  0x79   :  { %3207 = vmatprep.mubr.msk.f32.mxu0 %vm91_vm0, %v4126_v3 }
  0x7c   :  { %3208 = vmatmul.mubr.msk.f32.gmra.mrb[34].mxu0 %vm91_vm0, %v4132_v4 }
  0x7d   :  { %3210 = vmatprep.mubr.msk.f32.mxu0 %vm91_vm0, %v4134_v5 }
  0x80   :  { %3211 = vmatmul.mubr.msk.f32.gmra.mrb[36].mxu0 %vm91_vm0, %v4140_v6 }
  0x81   :  { %3213 = vmatprep.mubr.msk.f32.mxu0 %vm91_vm0, %v4142_v7 }
  0x84   :  { %3214 = vmatmul.mubr.msk.f32.gmra.mrb[38].mxu0 %vm91_vm0, %v4148_v8 }
  0x85   :  { %3326 = vmatprep.mubr.msk.f32.mxu0 %vm3919_vm2, %v5402_v51 }
 0x10b   :  { %v3158_v9 = vpop.f32.mrb[0].mxu0 }
 0x10c   :  { %v278_v10 = vpop.f32.mrb[1].mxu0 }
 0x10d   :  { %3227 = vmatmul.mubr.msk.f32.vlgmr.msra.gmra.mrb[0].mxu1 %vm91_vm0, %v278_v10 }
 0x10e   :  { %3635 = vmatpush3.bf16.xpose.msk.msra.mxu1 %vm3968_vm1, %v3633_v19  ;;  %3229 = vmatprep.mubr.msk.f32.mxu1 %vm3919_vm2, %v5402_v51 }
 0x10f   :  { %v3161_v16 = vpop.f32.mrb[2].mxu0  ;;  %3636 = vmatprep.subr.bf16.mxu1 %v3917_v0 }
 0x110   :  { %v288_v17 = vpop.f32.mrb[3].mxu0 }
 0x111   :  { %3230 = vmatmul.mubr.msk.f32.gmra.mrb[2].mxu1 %vm91_vm0, %v3158_v9 }
 0x112   :  { %3232 = vmatprep.mubr.msk.f32.mxu1 %vm3919_vm2, %v5402_v51 }
 0x113   :  { %v3164_v22 = vpop.f32.mrb[4].mxu0 }
 0x114   :  { %v298_v25 = vpop.f32.mrb[5].mxu0 }
 0x115   :  { %3233 = vmatmul.mubr.msk.f32.gmra.mrb[4].mxu1 %vm91_vm0, %v288_v17  ;;  %v4220_v17 = vpack.c.bf16 %v4116_v63, %v4110_v62 }
 0x116   :  { %3639 = vmatpush3.bf16.xpose.msk.msra.mxu1 %vm3968_vm1, %v3637_v24  ;;  %3235 = vmatprep.mubr.msk.f32.mxu1 %vm3919_vm2, %v5402_v51 }
 0x117   :  { %3249 = vmatprep.subr.mxu1 %v5402_v51  ;;  %v3167_v19 = vpop.f32.mrb[6].mxu0 }
 0x118   :  { %v308_v26 = vpop.f32.mrb[7].mxu0 }
 0x119   :  { %3236 = vmatmul.mubr.msk.f32.gmra.mrb[6].mxu1 %vm91_vm0, %v3161_v16 }
 0x11a   :  { %3238 = vmatprep.mubr.msk.f32.mxu1 %vm3919_vm2, %v5402_v51 }
 0x11b   :  { %v3170_v28 = vpop.f32.mrb[8].mxu0 }
 0x11c   :  { %v318_v29 = vpop.f32.mrb[9].mxu0 }
 0x11d   :  { %3239 = vmatmul.mubr.msk.f32.gmra.mrb[8].mxu1 %vm91_vm0, %v298_v25  ;;  %v4248_v25 = vpack.c.bf16 %v4124_v2, %v4118_v1 }
 0x11e   :  { %3250 = vmatpush3.xpose.msk.msra.mxu1 %vm91_vm0, %v4063_v58  ;;  %3251 = vmatprep.mubr.msk.f32.mxu1 %vm3919_vm2, %v5402_v51 }
 0x11f   :  { %3640 = vmatprep.subr.bf16.mxu1 %v3917_v0  ;;  %v3173_v24 = vpop.f32.mrb[10].mxu0 }
 0x120   :  { %v328_v35 = vpop.f32.mrb[11].mxu0 }
 0x121   :  { %3252 = vmatmul.mubr.msk.f32.vlgmr.msra.gmra.mrb[10].mxu1 %vm91_vm0, %v3164_v22 }
 0x122   :  { %3643 = vmatpush3.bf16.xpose.msk.msra.mxu1 %vm3968_vm1, %v3995_v27  ;;  %3254 = vmatprep.mubr.msk.f32.mxu1 %vm3919_vm2, %v5402_v51 }
 0x123   :  { %3644 = vmatprep.subr.bf16.mxu1 %v3917_v0  ;;  %v3176_v36 = vpop.f32.mrb[12].mxu0 }
 0x124   :  { %v338_v37 = vpop.f32.mrb[13].mxu0 }
 0x125   :  { %3255 = vmatmul.mubr.msk.f32.gmra.mrb[12].mxu1 %vm91_vm0, %v308_v26 }
 0x126   :  { %3257 = vmatprep.mubr.msk.f32.mxu1 %vm3919_vm2, %v5402_v51 }
 0x127   :  { %v3179_v52 = vpop.f32.mrb[14].mxu0 }
 0x128   :  { %v348_v53 = vpop.f32.mrb[15].mxu0 }
 0x129   :  { %3258 = vmatmul.mubr.msk.f32.gmra.mrb[14].mxu1 %vm91_vm0, %v3167_v19 }
 0x12a   :  { %3647 = vmatpush3.bf16.xpose.msk.msra.mxu1 %vm3968_vm1, %v4000_v31  ;;  %3260 = vmatprep.mubr.msk.f32.mxu1 %vm3919_vm2, %v5402_v51 }
 0x12b   :  { %3274 = vmatprep.subr.mxu1 %v5402_v51  ;;  %v4203_v55 = vpop.f32.mrb[16].mxu0 }
 0x12c   :  { %v358_v56 = vpop.f32.mrb[17].mxu0 }
 0x12d   :  { %3261 = vmatmul.mubr.msk.f32.gmra.mrb[16].mxu1 %vm91_vm0, %v318_v29 }
 0x12e   :  { %3263 = vmatprep.mubr.msk.f32.mxu1 %vm3919_vm2, %v5402_v51 }
 0x12f   :  { %v4208_v9 = vpop.f32.mrb[18].mxu0 }
 0x130   :  { %v4210_v10 = vpop.f32.mrb[19].mxu0 }
 0x131   :  { %3264 = vmatmul.mubr.msk.f32.gmra.mrb[18].mxu1 %vm91_vm0, %v3170_v28 }
 0x132   :  { %3275 = vmatpush3.xpose.msk.msra.mxu1 %vm91_vm0, %v4074_v59  ;;  %3276 = vmatprep.mubr.msk.f32.mxu1 %vm3919_vm2, %v5402_v51 }
 0x133   :  { %3648 = vmatprep.subr.bf16.mxu1 %v3917_v0  ;;  %v3188_v16 = vpop.f32.mrb[20].mxu0 }
 0x134   :  { %v378_v22 = vpop.f32.mrb[21].mxu0 }
 0x135   :  { %3277 = vmatmul.mubr.msk.f32.vlgmr.msra.gmra.mrb[20].mxu1 %vm91_vm0, %v328_v35  ;;  %3327 = vmatmul.mubr.msk.f32.vlgmr.msra.gmra.mrb[40].mxu0 %vm91_vm0, %v378_v22 }
 0x136   :  { %3651 = vmatpush3.bf16.xpose.msk.msra.mxu1 %vm3968_vm1, %v3649_v38  ;;  %3279 = vmatprep.mubr.msk.f32.mxu1 %vm3919_vm2, %v5402_v51 }
 0x137   :  { %3652 = vmatprep.subr.bf16.mxu1 %v3917_v0  ;;  %3329 = vmatprep.mubr.msk.f32.mxu0 %vm3919_vm2, %v5402_v51  ;;  %v3191_v62 = vpop.f32.mrb[22].mxu0 }
 0x138   :  { %v388_v63 = vpop.f32.mrb[23].mxu0  ;;  %3675 = vmatpush3.bf16.xpose.msk.msra.mxu0 %vm3968_vm1, %v4220_v17 }
 0x139   :  { %3280 = vmatmul.mubr.msk.f32.gmra.mrb[22].mxu1 %vm91_vm0, %v3173_v24  ;;  %3330 = vmatmul.mubr.msk.f32.gmra.mrb[42].mxu0 %vm91_vm0, %v3188_v16 }
 0x13a   :  { %3282 = vmatprep.mubr.msk.f32.mxu1 %vm3919_vm2, %v5402_v51  ;;  %3332 = vmatprep.mubr.msk.f32.mxu0 %vm3919_vm2, %v5402_v51 }
 0x13b   :  { %v4243_v38 = vpop.f32.mrb[24].mxu0  ;;  %3676 = vmatprep.subr.bf16.mxu0 %v3917_v0 }
 0x13c   :  { %v398_v19 = vpop.f32.mrb[25].mxu0 }
 0x13d   :  { %3283 = vmatmul.mubr.msk.f32.gmra.mrb[24].mxu1 %vm91_vm0, %v338_v37  ;;  %3333 = vmatmul.mubr.msk.f32.gmra.mrb[44].mxu0 %vm91_vm0, %v388_v63 }
 0x13e   :  { %3655 = vmatpush3.bf16.xpose.msk.msra.mxu1 %vm3968_vm1, %v3653_v40  ;;  %3285 = vmatprep.mubr.msk.f32.mxu1 %vm3919_vm2, %v5402_v51 }
 0x13f   :  { %3299 = vmatprep.subr.mxu1 %v5402_v51  ;;  %3335 = vmatprep.mubr.msk.f32.mxu0 %vm3919_vm2, %v5402_v51  ;;  %v3197_v1 = vpop.f32.mrb[26].mxu0 }
 0x140   :  { %v408_v2 = vpop.f32.mrb[27].mxu0  ;;  %3679 = vmatpush3.bf16.xpose.msk.msra.mxu0 %vm3968_vm1, %v4248_v25 }
 0x141   :  { %3286 = vmatmul.mubr.msk.f32.gmra.mrb[26].mxu1 %vm91_vm0, %v3176_v36  ;;  %3336 = vmatmul.mubr.msk.f32.gmra.mrb[46].mxu0 %vm91_vm0, %v3191_v62 }
 0x142   :  { %3288 = vmatprep.mubr.msk.f32.mxu1 %vm3919_vm2, %v5402_v51  ;;  %3338 = vmatprep.mubr.msk.f32.mxu0 %vm3919_vm2, %v5402_v51 }
 0x143   :  { %v3200_v40 = vpop.f32.mrb[28].mxu0  ;;  %3374 = vmatprep.subr.mxu0 %v5402_v51 }
 0x144   :  { %v418_v26 = vpop.f32.mrb[29].mxu0 }
 0x145   :  { %3289 = vmatmul.mubr.msk.f32.gmra.mrb[28].mxu1 %vm91_vm0, %v348_v53  ;;  %3339 = vmatmul.mubr.msk.f32.gmra.mrb[48].mxu0 %vm91_vm0, %v398_v19 }
 0x146   :  { %3300 = vmatpush3.xpose.msk.msra.mxu1 %vm91_vm0, %v4090_v60  ;;  %3301 = vmatprep.mubr.msk.f32.mxu1 %vm3919_vm2, %v5402_v51 }
 0x147   :  { %3664 = vmatprep.subr.bf16.mxu1 %v3917_v0  ;;  %v3203_v28 = vpop.f32.mrb[30].mxu0  ;;  %3376 = vmatprep.mubr.msk.f32.mxu0 %vm3919_vm2, %v5402_v51 }
 0x148   :  { %3375 = vmatpush3.xpose.msk.msra.mxu0 %vm91_vm0, %v4126_v3  ;;  %v428_v29 = vpop.f32.mrb[31].mxu0 }
 0x149   :  { %3302 = vmatmul.mubr.msk.f32.vlgmr.msra.gmra.mrb[30].mxu1 %vm91_vm0, %v3179_v52 }
 0x14a   :  { %3667 = vmatpush3.bf16.xpose.msk.msra.mxu1 %vm3968_vm1, %v3665_v47  ;;  %3304 = vmatprep.mubr.msk.f32.mxu1 %vm3919_vm2, %v5402_v51 }
 0x14b   :  { %3668 = vmatprep.subr.bf16.mxu1 %v3917_v0  ;;  %3377 = vmatmul.mubr.msk.f32.vlgmr.msra.gmra.mrb[50].mxu0 %vm91_vm0, %v428_v29  ;;  %v3206_v24 = vpop.f32.mrb[32].mxu0 }
 0x14c   :  { %3379 = vmatprep.mubr.msk.f32.mxu0 %vm3919_vm2, %v5402_v51  ;;  %v438_v35 = vpop.f32.mrb[33].mxu0 }
 0x14d   :  { %3305 = vmatmul.mubr.msk.f32.gmra.mrb[32].mxu1 %vm91_vm0, %v358_v56  ;;  %v3685_v56 = vpack.c.bf16 %v4142_v7, %v4140_v6 }
 0x14e   :  { %3307 = vmatprep.mubr.msk.f32.mxu1 %vm3919_vm2, %v5402_v51 }
 0x14f   :  { %3380 = vmatmul.mubr.msk.f32.gmra.mrb[52].mxu0 %vm91_vm0, %v3203_v28  ;;  %v3209_v47 = vpop.f32.mrb[34].mxu0 }
 0x150   :  { %3382 = vmatprep.mubr.msk.f32.mxu0 %vm3919_vm2, %v5402_v51  ;;  %v448_v36 = vpop.f32.mrb[35].mxu0 }
 0x151   :  { %3308 = vmatmul.mubr.msk.f32.gmra.mrb[34].mxu1 %vm91_vm0, %v4203_v55  ;;  %v3681_v55 = vpack.c.bf16 %v4134_v5, %v4132_v4 }
 0x152   :  { %3671 = vmatpush3.bf16.xpose.msk.msra.mxu1 %vm3968_vm1, %v3669_v50  ;;  %3310 = vmatprep.mubr.msk.f32.mxu1 %vm3919_vm2, %v5402_v51 }
 0x153   :  { %3349 = vmatprep.subr.mxu1 %v5402_v51  ;;  %3383 = vmatmul.mubr.msk.f32.gmra.mrb[54].mxu0 %vm91_vm0, %v438_v35  ;;  %v3212_v37 = vpop.f32.mrb[36].mxu0 }
 0x154   :  { %3385 = vmatprep.mubr.msk.f32.mxu0 %vm3919_vm2, %v5402_v51  ;;  %v458_v52 = vpop.f32.mrb[37].mxu0 }
 0x155   :  { %3311 = vmatmul.mubr.msk.f32.gmra.mrb[36].mxu1 %vm91_vm0, %v4210_v10  ;;  %v1321_v10 = vpack.c.bf16 %v4063_v58, %v3986_v21 }
 0x156   :  { %3313 = vmatprep.mubr.msk.f32.mxu1 %vm3919_vm2, %v5402_v51 }
 0x157   :  { %3386 = vmatmul.mubr.msk.f32.gmra.mrb[56].mxu0 %vm91_vm0, %v3206_v24  ;;  %v3215_v50 = vpop.f32.mrb[38].mxu0 }
 0x158   :  { %3388 = vmatprep.mubr.msk.f32.mxu0 %vm3919_vm2, %v5402_v51  ;;  %v468_v53 = vpop.f32.mrb[39].mxu0 }
 0x159   :  { %3314 = vmatmul.mubr.msk.f32.gmra.mrb[38].mxu1 %vm91_vm0, %v4208_v9  ;;  %v3704_v9 = vld [vmem:[%s5400_s2 + $0x18] sm:$0xff]  }
 0x15a   :  { %3350 = vmatpush3.xpose.msk.msra.mxu1 %vm91_vm0, %v4108_v61  ;;  %3351 = vmatprep.mubr.msk.f32.mxu1 %vm3919_vm2, %v5402_v51 }
 0x15b   :  { %3680 = vmatprep.subr.bf16.mxu1 %v3917_v0  ;;  %3389 = vmatmul.mubr.msk.f32.gmra.mrb[58].mxu0 %vm91_vm0, %v448_v36 }
 0x15c   :  { %3424 = vmatprep.mubr.msk.bf16.mxu0 %vm91_vm0, %v3972_v12  ;;  %v3703_v12 = vld [vmem:[%s5400_s2 + $0x10] sm:$0xff]  }
 0x15d   :  { %3352 = vmatmul.mubr.msk.f32.vlgmr.msra.gmra.mrb[40].mxu1 %vm91_vm0, %v4243_v38 }
 0x15e   :  { %3354 = vmatprep.mubr.msk.f32.mxu1 %vm3919_vm2, %v5402_v51  ;;  %3683 = vmatpush3.bf16.xpose.msk.msra.mxu1 %vm3968_vm1, %v3681_v55  ;;  %v1335_v55 = vpack.c.bf16 %v4140_v6, %v4134_v5 }
 0x15f   :  { %3684 = vmatprep.subr.bf16.mxu1 %v3917_v0  ;;  %v3701_v0 = vld [vmem:[%s5400_s2] sm:$0xff]  }
 0x160   :  { %3416 = vmatprep.subr.bf16.mxu0 %v3701_v0 }
 0x161   :  { %3355 = vmatmul.mubr.msk.f32.gmra.mrb[42].mxu1 %vm91_vm0, %v408_v2  ;;  %3417 = vmatpush3.bf16.msra.mxu0 %v3701_v0 }
 0x162   :  { %3357 = vmatprep.mubr.msk.f32.mxu1 %vm3919_vm2, %v5402_v51  ;;  %3418 = vmatprep.subr.bf16.mxu0 %v3702_v11 }
 0x165   :  { %3358 = vmatmul.mubr.msk.f32.gmra.mrb[44].mxu1 %vm91_vm0, %v3197_v1  ;;  %3419 = vmatpush3.bf16.msra.mxu0 %v3702_v11 }
 0x166   :  { %3360 = vmatprep.mubr.msk.f32.mxu1 %vm3919_vm2, %v5402_v51  ;;  %3687 = vmatpush3.bf16.xpose.msk.msra.mxu1 %vm3968_vm1, %v3685_v56 }
 0x167   :  { %3399 = vmatprep.subr.mxu1 %v5402_v51  ;;  %3420 = vmatprep.subr.bf16.mxu0 %v3703_v12 }
 0x169   :  { %3361 = vmatmul.mubr.msk.f32.gmra.mrb[46].mxu1 %vm91_vm0, %v418_v26  ;;  %3421 = vmatpush3.bf16.msra.mxu0 %v3703_v12  ;;  %v1336_v12 = vpack.c.bf16 %v4148_v8, %v4142_v7 }
 0x16a   :  { %3363 = vmatprep.mubr.msk.f32.mxu1 %vm3919_vm2, %v5402_v51  ;;  %3422 = vmatprep.subr.bf16.mxu0 %v3704_v9 }
 0x16d   :  { %3364 = vmatmul.mubr.msk.f32.gmra.mrb[48].mxu1 %vm91_vm0, %v3200_v40  ;;  %3423 = vmatpush3.bf16.msra.mxu0 %v3704_v9 }
 0x16e   :  { %3400 = vmatpush3.xpose.msk.msra.mxu1 %vm91_vm0, %v4148_v8  ;;  %3401 = vmatprep.mubr.msk.f32.mxu1 %vm3919_vm2, %v5402_v51 }
 0x16f   :  { %3688 = vmatprep.subr.bf16.mxu1 %v5402_v51  ;;  %3464 = vmatprep.subr.bf16.mxu0 %v5402_v51 }
 0x170   :  { %3425 = vmatmul.mubr.msk.bf16.vlgmr.msra.gmra.mrb[60].mxu0 %vm91_vm0, %v4014_v41  ;;  %v1622_v41 = vlaneseq }
 0x171   :  { %3402 = vmatmul.mubr.msk.f32.vlgmr.msra.gmra.mrb[50].mxu1 %vm91_vm0, %v3209_v47  ;;  %3428 = vmatprep.mubr.msk.bf16.mxu0 %vm91_vm0, %v1319_v18 }
 0x172   :  { %3404 = vmatprep.mubr.msk.f32.mxu1 %vm3919_vm2, %v5402_v51  ;;  %v1623_v14 = vshrl.u32 %v1622_v41, 7  ;;  %v1629_v20 = vand.u32 127, %v1622_v41 }
 0x174   :  { %v1625_v18 = vadd.s32 16, %v1623_v14  ;;  %vm1635_vm4 = vcmp.lt.s32.totalorder %v1629_v20, 36  ;;  %v1627_v32 = vadd.s32 32, %v1623_v14  ;;  %vm1630_vm11 = vcmp.le.s32.totalorder %v1629_v20, %v1623_v14 }
 0x175   :  { %3405 = vmatmul.mubr.msk.f32.gmra.mrb[52].mxu1 %vm91_vm0, %v458_v52  ;;  %v1624_v19 = vadd.s32 8, %v1623_v14  ;;  %vm4463_vm12 = vmand %vm1630_vm11, %vm1635_vm4 }
 0x176   :  { %3407 = vmatprep.mubr.msk.f32.mxu1 %vm3919_vm2, %v5402_v51  ;;  %vm1632_vm3 = vcmp.le.s32.totalorder %v1629_v20, %v1625_v18  ;;  %vm1634_vm9 = vcmp.le.s32.totalorder %v1629_v20, %v1627_v32 }
 0x177   :  { %vm4419_vm5 = vmand %vm1632_vm3, %vm1635_vm4  ;;  %vm1631_vm13 = vcmp.le.s32.totalorder %v1629_v20, %v1624_v19 }
 0x178   :  { %3429 = vmatmul.mubr.msk.bf16.gmra.mrb[64].mxu0 %vm91_vm0, %v1320_v23  ;;  %v1326_v23 = vpack.c.bf16 %v4090_v60, %v4006_v34  ;;  %vm4444_vm10 = vmand %vm1634_vm9, %vm1635_vm4 }
 0x179   :  { %3408 = vmatmul.mubr.msk.f32.gmra.mrb[54].mxu1 %vm91_vm0, %v3212_v37  ;;  %3432 = vmatprep.mubr.msk.bf16.mxu0 %vm91_vm0, %v1321_v10  ;;  %vm4479_vm14 = vmand %vm1631_vm13, %vm1635_vm4 }
 0x17a   :  { %3410 = vmatprep.mubr.msk.f32.mxu1 %vm3919_vm2, %v5402_v51 }
 0x17d   :  { %3411 = vmatmul.mubr.msk.f32.gmra.mrb[56].mxu1 %vm91_vm0, %v468_v53 }
 0x17e   :  { %3413 = vmatprep.mubr.msk.f32.mxu1 %vm3919_vm2, %v5402_v51 }
 0x180   :  { %3433 = vmatmul.mubr.msk.bf16.gmra.mrb[68].mxu0 %vm91_vm0, %v3995_v27  ;;  %v1626_v27 = vadd.s32 24, %v1623_v14 }
 0x181   :  { %3414 = vmatmul.mubr.msk.f32.gmra.mrb[58].mxu1 %vm91_vm0, %v3215_v50  ;;  %3436 = vmatprep.mubr.msk.bf16.mxu0 %vm91_vm0, %v4000_v31  ;;  %v1334_v50 = vpack.c.bf16 %v4132_v4, %v4126_v3 }
 0x182   :  { %3474 = vmatprep.mubr.msk.bf16.mxu1 %vm3919_vm2, %v5402_v51  ;;  %vm1633_vm6 = vcmp.le.s32.totalorder %v1629_v20, %v1626_v27 }
 0x183   :  { %vm4433_vm8 = vmand %vm1633_vm6, %vm1635_vm4 }
 0x188   :  { %3437 = vmatmul.mubr.msk.bf16.gmra.mrb[72].mxu0 %vm91_vm0, %v1324_v13 }
 0x189   :  { %3440 = vmatprep.mubr.msk.bf16.mxu0 %vm91_vm0, %v1325_v39 }
 0x190   :  { %3441 = vmatmul.mubr.msk.bf16.gmra.mrb[76].mxu0 %vm91_vm0, %v1326_v23 }
 0x191   :  { %3444 = vmatprep.mubr.msk.bf16.mxu0 %vm91_vm0, %v4041_v54 }
 0x198   :  { %3445 = vmatmul.mubr.msk.bf16.gmra.mrb[80].mxu0 %vm91_vm0, %v4057_v57  ;;  %v1331_v57 = vpack.c.bf16 %v4108_v61, %v4030_v49 }
 0x199   :  { %3448 = vmatprep.mubr.msk.bf16.mxu0 %vm91_vm0, %v1329_v46 }
 0x1a0   :  { %3449 = vmatmul.mubr.msk.bf16.gmra.mrb[84].mxu0 %vm91_vm0, %v1330_v48 }
 0x1a1   :  { %3452 = vmatprep.mubr.msk.bf16.mxu0 %vm91_vm0, %v1331_v57 }
 0x1a8   :  { %3453 = vmatmul.mubr.msk.bf16.gmra.mrb[88].mxu0 %vm91_vm0, %v4220_v17 }
 0x1a9   :  { %3456 = vmatprep.mubr.msk.bf16.mxu0 %vm91_vm0, %v4248_v25 }
 0x1b0   :  { %3457 = vmatmul.mubr.msk.bf16.gmra.mrb[92].mxu0 %vm91_vm0, %v1334_v50 }
 0x1b1   :  { %3460 = vmatprep.mubr.msk.bf16.mxu0 %vm91_vm0, %v1335_v55 }
 0x1b8   :  { %3461 = vmatmul.mubr.msk.bf16.gmra.mrb[96].mxu0 %vm91_vm0, %v1336_v12  ;;  %vm2725_vm0 = vcmask 130048  }
 0x1b9   :  { %3470 = vmatprep.mubr.msk.bf16.mxu0 %vm3919_vm2, %v5402_v51 }
 0x1e0   :  { %v4412_v15 = vpop.f32.mrb[0].mxu1 }
 0x1e1   :  { %v3228_v21 = vpop.f32.mrb[1].mxu1 }
 0x1e4   :  { %v4416_v31 = vpop.f32.mrb[2].mxu1 }
 0x1e5   :  { %v3231_v30 = vpop.f32.mrb[3].mxu1 }
 0x1e8   :  { %v568_v33 = vpop.f32.mrb[4].mxu1 }
 0x1e9   :  { %v4428_v34 = vsel %vm4419_vm5, %v568_v33, -1e+30  ;;  %v3234_v39 = vpop.f32.mrb[5].mxu1 }
 0x1ea   :  { %v1698_v59 = vsel %vm1691_vm7, %v4428_v34, -inf }
 0x1eb   :  { %1699 = vmax.xlane.f32.xlu0 %v1698_v59 }
 0x1ec   :  { %v573_v16 = vpop.f32.mrb[6].mxu1 }
 0x1ed   :  { %v4439_v54 = vsel %vm4433_vm8, %v573_v16, -1e+30  ;;  %v3237_v22 = vpop.f32.mrb[7].mxu1 }
 0x1ee   :  { %v1701_v62 = vsel %vm1691_vm7, %v4439_v54, -inf }
 0x1ef   :  { %1702 = vmax.xlane.f32.xlu0 %v1701_v62  ;;  %v4549_v62 = vsel %vm4463_vm12, %v4412_v15, -1e+30  ;;  %v4564_v15 = vsel %vm4479_vm14, %v4416_v31, -1e+30 }
 0x1f0   :  { %v578_v38 = vpop.f32.mrb[8].mxu1 }
 0x1f1   :  { %v4456_v1 = vsel %vm4444_vm10, %v578_v38, -1e+30  ;;  %v3240_v2 = vpop.f32.mrb[9].mxu1 }
 0x1f2   :  { %v1704_v40 = vsel %vm1691_vm7, %v4456_v1, -inf }
 0x1f3   :  { %1705 = vmax.xlane.f32.xlu1 %v1704_v40 }
 0x1f4   :  { %v663_v43 = vpop.f32.mrb[10].mxu1 }
 0x1f5   :  { %v4469_v46 = vsel %vm4463_vm12, %v663_v43, -1e+30  ;;  %v3253_v26 = vpop.f32.mrb[11].mxu1  ;;  %v1692_v43 = vsel %vm1691_vm7, %v4549_v62, -inf }
 0x1f6   :  { %v1707_v28 = vsel %vm1691_vm7, %v4469_v46, -inf }
 0x1f7   :  { %1708 = vmax.xlane.f32.xlu1 %v1707_v28 }
 0x1f8   :  { %v668_v61 = vpop.f32.mrb[12].mxu1 }
 0x1f9   :  { %v4485_v29 = vsel %vm4479_vm14, %v668_v61, -1e+30  ;;  %v3256_v24 = vpop.f32.mrb[13].mxu1 }
 0x1fa   :  { %v1710_v35 = vsel %vm1691_vm7, %v4485_v29, -inf }
 0x1fb   :  { %1711 = vmax.xlane.f32.xlu0 %v1710_v35 }
 0x1fc   :  { %v673_v44 = vpop.f32.mrb[14].mxu1 }
 0x1fd   :  { %v4491_v45 = vsel %vm4419_vm5, %v673_v44, -1e+30  ;;  %v3259_v48 = vpop.f32.mrb[15].mxu1  ;;  %v1695_v44 = vsel %vm1691_vm7, %v4564_v15, -inf }
 0x1fe   :  { %v1713_v47 = vsel %vm1691_vm7, %v4491_v45, -inf }
 0x1ff   :  { %1714 = vmax.xlane.f32.xlu1 %v1713_v47 }
 0x200   :  { %v678_v36 = vpop.f32.mrb[16].mxu1 }
 0x201   :  { %v4501_v37 = vsel %vm4433_vm8, %v678_v36, -1e+30  ;;  %v3262_v52 = vpop.f32.mrb[17].mxu1 }
 0x202   :  { %v1716_v53 = vsel %vm1691_vm7, %v4501_v37, -inf }
 0x203   :  { %1717 = vmax.xlane.f32.xlu0 %v1716_v53 }
 0x204   :  { %v683_v17 = vpop.f32.mrb[18].mxu1 }
 0x205   :  { %v4511_v25 = vsel %vm4444_vm10, %v683_v17, -1e+30  ;;  %v3265_v56 = vpop.f32.mrb[19].mxu1 }
 0x206   :  { %v1719_v0 = vsel %vm1691_vm7, %v4511_v25, -inf }
 0x207   :  { %1720 = vmax.xlane.f32.xlu1 %v1719_v0 }
 0x208   :  { %v768_v3 = vpop.f32.mrb[20].mxu1  ;;  %v978_v4 = vpop.f32.mrb[40].mxu0 }
 0x209   :  { %v4519_v5 = vsel %vm4463_vm12, %v768_v3, -1e+30  ;;  %v3278_v6 = vpop.f32.mrb[21].mxu1  ;;  %v3328_v11 = vpop.f32.mrb[41].mxu0  ;;  %v4584_v50 = vsel %vm4463_vm12, %v978_v4, -1e+30 }
 0x20a   :  { %v1722_v9 = vsel %vm1691_vm7, %v4519_v5, -inf  ;;  %v1752_v6 = vsel %vm1691_vm7, %v4584_v50, -inf }
 0x20b   :  { %1723 = vmax.xlane.f32.xlu0 %v1722_v9 }
 0x20c   :  { %v773_v10 = vpop.f32.mrb[22].mxu1  ;;  %v983_v41 = vpop.f32.mrb[42].mxu0 }
 0x20d   :  { %v4527_v13 = vsel %vm4479_vm14, %v773_v10, -1e+30  ;;  %v3281_v14 = vpop.f32.mrb[23].mxu1  ;;  %v3331_v18 = vpop.f32.mrb[43].mxu0  ;;  %v4572_v35 = vsel %vm4479_vm14, %v983_v41, -1e+30 }
 0x20e   :  { %v1725_v20 = vsel %vm1691_vm7, %v4527_v13, -inf  ;;  %v1755_v52 = vsel %vm1691_vm7, %v4572_v35, -inf }
 0x20f   :  { %1726 = vmax.xlane.f32.xlu1 %v1725_v20 }
 0x210   :  { %v778_v7 = vpop.f32.mrb[24].mxu1  ;;  %v988_v8 = vpop.f32.mrb[44].mxu0 }
 0x211   :  { %v4536_v21 = vsel %vm4419_vm5, %v778_v7, -1e+30  ;;  %v3284_v23 = vpop.f32.mrb[25].mxu1  ;;  %v3334_v27 = vpop.f32.mrb[45].mxu0  ;;  %v4612_v20 = vsel %vm4419_vm5, %v988_v8, -1e+30 }
 0x212   :  { %v1728_v30 = vsel %vm1691_vm7, %v4536_v21, -inf }
 0x213   :  { %1729 = vmax.xlane.f32.xlu0 %v1728_v30 }
 0x214   :  { %v783_v32 = vpop.f32.mrb[26].mxu1  ;;  %v993_v33 = vpop.f32.mrb[46].mxu0 }
 0x215   :  { %v4542_v39 = vsel %vm4433_vm8, %v783_v32, -1e+30  ;;  %v3287_v59 = vpop.f32.mrb[27].mxu1  ;;  %v3337_v16 = vpop.f32.mrb[47].mxu0  ;;  %v4602_v12 = vsel %vm4433_vm8, %v993_v33, -1e+30 }
 0x216   :  { %v1731_v22 = vsel %vm1691_vm7, %v4542_v39, -inf  ;;  %v1761_v18 = vsel %vm1691_vm7, %v4602_v12, -inf  ;;  %v1758_v59 = vsel %vm1691_vm7, %v4612_v20, -inf }
 0x217   :  { %1732 = vmax.xlane.f32.xlu1 %v1731_v22 }
 0x218   :  { %v788_v38 = vpop.f32.mrb[28].mxu1  ;;  %v4551_v19 = vpop.f32.mrb[48].mxu0 }
 0x219   :  { %v4555_v2 = vsel %vm4444_vm10, %v788_v38, -1e+30  ;;  %v3290_v40 = vpop.f32.mrb[29].mxu1  ;;  %v3340_v57 = vpop.f32.mrb[49].mxu0 }
 0x21a   :  { %v1734_v26 = vsel %vm1691_vm7, %v4555_v2, -inf }
 0x21b   :  { %1693 = vmax.xlane.f32.xlu1 %v1692_v43  ;;  %1735 = vmax.xlane.f32.xlu0 %v1734_v26 }
 0x21c   :  { %v873_v28 = vpop.f32.mrb[30].mxu1 }
 0x21d   :  { %v4568_v61 = vsel %vm4463_vm12, %v873_v28, -1e+30  ;;  %v3303_v24 = vpop.f32.mrb[31].mxu1 }
 0x21e   :  { %v1737_v48 = vsel %vm1691_vm7, %v4568_v61, -inf  ;;  %v4578_v31 = vpop.f32.mrb[50].mxu0 }
 0x21f   :  { %1696 = vmax.xlane.f32.xlu0 %v1695_v44  ;;  %1738 = vmax.xlane.f32.xlu1 %v1737_v48  ;;  %v3378_v47 = vpop.f32.mrb[51].mxu0 }
 0x220   :  { %v878_v36 = vpop.f32.mrb[32].mxu1 }
 0x221   :  { %v4588_v53 = vsel %vm4479_vm14, %v878_v36, -1e+30  ;;  %v3306_v55 = vpop.f32.mrb[33].mxu1 }
 0x222   :  { %v1740_v17 = vsel %vm1691_vm7, %v4588_v53, -inf  ;;  %v4592_v56 = vpop.f32.mrb[52].mxu0 }
 0x223   :  { %1741 = vmax.xlane.f32.xlu0 %v1740_v17  ;;  %1756 = vmax.xlane.f32.xlu1 %v1755_v52  ;;  %v3381_v0 = vpop.f32.mrb[53].mxu0 }
 0x224   :  { %v883_v3 = vpop.f32.mrb[34].mxu1 }
 0x225   :  { %v4598_v4 = vsel %vm4419_vm5, %v883_v3, -1e+30  ;;  %v3309_v11 = vpop.f32.mrb[35].mxu1 }
 0x226   :  { %v1743_v9 = vsel %vm1691_vm7, %v4598_v4, -inf  ;;  %v4606_v10 = vpop.f32.mrb[54].mxu0 }
 0x227   :  { %1753 = vmax.xlane.f32.xlu0 %v1752_v6  ;;  %1744 = vmax.xlane.f32.xlu1 %v1743_v9  ;;  %v3384_v41 = vpop.f32.mrb[55].mxu0 }
 0x228   :  { %v888_v14 = vpop.f32.mrb[36].mxu1 }
 0x229   :  { %v4616_v7 = vsel %vm4433_vm8, %v888_v14, -1e+30  ;;  %v3312_v23 = vpop.f32.mrb[37].mxu1 }
 0x22a   :  { %v1746_v27 = vsel %vm1691_vm7, %v4616_v7, -inf  ;;  %v4620_v30 = vpop.f32.mrb[56].mxu0 }
 0x22b   :  { %1747 = vmax.xlane.f32.xlu0 %v1746_v27  ;;  %1762 = vmax.xlane.f32.xlu1 %v1761_v18  ;;  %v3387_v32 = vpop.f32.mrb[57].mxu0 }
 0x22c   :  { %v893_v33 = vpop.f32.mrb[38].mxu1 }
 0x22d   :  { %v4626_v8 = vsel %vm4444_vm10, %v893_v33, -1e+30  ;;  %v3315_v16 = vpop.f32.mrb[39].mxu1 }
 0x22e   :  { %v1749_v22 = vsel %vm1691_vm7, %v4626_v8, -inf  ;;  %v4630_v38 = vpop.f32.mrb[58].mxu0 }
 0x22f   :  { %1759 = vmax.xlane.f32.xlu0 %v1758_v59  ;;  %1750 = vmax.xlane.f32.xlu1 %v1749_v22  ;;  %v3390_v40 = vpop.f32.mrb[59].mxu0 }
 0x230   :  { %v1083_v57 = vpop.f32.mrb[40].mxu1 }
 0x231   :  { %v4634_v43 = vsel %vm4463_vm12, %v1083_v57, -1e+30  ;;  %v3353_v26 = vpop.f32.mrb[41].mxu1 }
 0x232   :  { %v1767_v28 = vsel %vm1691_vm7, %v4634_v43, -inf }
 0x233   :  { %1768 = vmax.xlane.f32.xlu0 %v1767_v28 }
 0x234   :  { %v1088_v24 = vpop.f32.mrb[42].mxu1 }
 0x235   :  { %v4640_v44 = vsel %vm4479_vm14, %v1088_v24, -1e+30  ;;  %v3356_v48 = vpop.f32.mrb[43].mxu1 }
 0x236   :  { %v1770_v47 = vsel %vm1691_vm7, %v4640_v44, -inf }
 0x237   :  { %1771 = vmax.xlane.f32.xlu1 %v1770_v47 }
 0x238   :  { %v1093_v36 = vpop.f32.mrb[44].mxu1 }
 0x239   :  { %v4646_v52 = vsel %vm4419_vm5, %v1093_v36, -1e+30  ;;  %v3359_v55 = vpop.f32.mrb[45].mxu1 }
 0x23a   :  { %v1773_v17 = vsel %vm1691_vm7, %v4646_v52, -inf }
 0x23b   :  { %1774 = vmax.xlane.f32.xlu0 %v1773_v17 }
 0x23c   :  { %v1098_v0 = vpop.f32.mrb[46].mxu1 }
 0x23d   :  { %v4652_v3 = vsel %vm4433_vm8, %v1098_v0, -1e+30  ;;  %v3362_v6 = vpop.f32.mrb[47].mxu1 }
 0x23e   :  { %v1776_v11 = vsel %vm1691_vm7, %v4652_v3, -inf }
 0x23f   :  { %1777 = vmax.xlane.f32.xlu1 %v1776_v11 }
 0x240   :  { %v1103_v9 = vpop.f32.mrb[48].mxu1 }
 0x241   :  { %v3365_v41 = vpop.f32.mrb[49].mxu1 }
 0x244   :  { %v1293_v14 = vpop.f32.mrb[50].mxu1 }
 0x245   :  { %v3403_v18 = vpop.f32.mrb[51].mxu1 }
 0x246   :  { %v4672_v18 = vsel %vm4444_vm10, %v1103_v9, -1e+30 }
 0x248   :  { %v1298_v23 = vpop.f32.mrb[52].mxu1 }
 0x249   :  { %v3406_v27 = vpop.f32.mrb[53].mxu1 }
 0x24c   :  { %v4656_v32 = vpop.f32.mrb[54].mxu1 }
 0x24d   :  { %v3409_v33 = vpop.f32.mrb[55].mxu1 }
 0x250   :  { %v4658_v59 = vpop.f32.mrb[56].mxu1 }
 0x251   :  { %v3412_v16 = vpop.f32.mrb[57].mxu1 }
 0x254   :  { %v4660_v22 = vpop.f32.mrb[58].mxu1 }
 0x255   :  { %v3415_v40 = vpop.f32.mrb[59].mxu1 }
 0x256   :  { %v1779_v40 = vsel %vm1691_vm7, %v4672_v18, -inf }
 0x278   :  { %v1700_v57 = vpop.xlane.xlu0 %1699 }
 0x279   :  { %v1814_v26 = vsub.f32 %v4428_v34, %v1700_v57  ;;  %v4684_v57 = vsel %vm4444_vm10, %v4551_v19, -1e+30  ;;  %v4696_v19 = vsel %vm4463_vm12, %v4578_v31, -1e+30 }
 0x27a   :  { %v1782_v31 = vsel %vm1691_vm7, %v4696_v19, -inf }
 0x27b   :  { %v1856_v28 = vmul.f32 1.442695, %v1814_v26 }
 0x27c   :  { %v1703_v24 = vpop.xlane.xlu0 %1702 }
 0x27d   :  { %3705 = vpow2.f32 %v1856_v28  ;;  %v1815_v48 = vsub.f32 %v4439_v54, %v1703_v24  ;;  %v1764_v24 = vsel %vm1691_vm7, %v4684_v57, -inf }
 0x27f   :  { %v1858_v47 = vmul.f32 1.442695, %v1815_v48  ;;  %v4701_v48 = vsel %vm4479_vm14, %v4592_v56, -1e+30 }
 0x280   :  { %v1706_v36 = vpop.xlane.xlu1 %1705 }
 0x281   :  { %3707 = vpow2.f32 %v1858_v47  ;;  %v1816_v55 = vsub.f32 %v4456_v1, %v1706_v36 }
 0x283   :  { %v1860_v17 = vmul.f32 1.442695, %v1816_v55  ;;  %v4706_v55 = vsel %vm4463_vm12, %v1293_v14, -1e+30  ;;  %v4719_v14 = vsel %vm4479_vm14, %v1298_v23, -1e+30 }
 0x284   :  { %v1709_v0 = vpop.xlane.xlu1 %1708 }
 0x285   :  { %3709 = vpow2.f32 %v1860_v17  ;;  %v1817_v11 = vsub.f32 %v4469_v46, %v1709_v0  ;;  %v1785_v0 = vsel %vm1691_vm7, %v4701_v48, -inf }
 0x287   :  { %v4665_v6 = vpop.eup %3705  ;;  %v1862_v1 = vmul.f32 1.442695, %v1817_v11 }
 0x288   :  { %v1712_v41 = vpop.xlane.xlu0 %1711  ;;  %v1938_v34 = vsel %vm1691_vm7, %v4665_v6, 0.0 }
 0x289   :  { %v1818_v54 = vsub.f32 %v4485_v29, %v1712_v41  ;;  %1939 = vadd.xlane.f32.xlu0 %v1938_v34 }
 0x28b   :  { %v4675_v27 = vpop.eup %3707  ;;  %v1864_v33 = vmul.f32 1.442695, %v1818_v54  ;;  %v1800_v54 = vsel %vm1691_vm7, %v4719_v14, -inf }
 0x28c   :  { %v1715_v16 = vpop.xlane.xlu1 %1714  ;;  %v1941_v46 = vsel %vm1691_vm7, %v4675_v27, 0.0 }
 0x28d   :  { %3711 = vpow2.f32 %v1864_v33  ;;  %1780 = vmax.xlane.f32.xlu0 %v1779_v40  ;;  %1942 = vadd.xlane.f32.xlu1 %v1941_v46  ;;  %v1819_v9 = vsub.f32 %v4491_v45, %v1715_v16  ;;  %v4733_v46 = vsel %vm4419_vm5, %v4606_v10, -1e+30 }
 0x28e   :  { %3713 = vpow2.f32 %v1862_v1  ;;  %v3426_v1 = vpop.f32.mrb[60].mxu0 }
 0x28f   :  { %v4686_v29 = vpop.eup %3709  ;;  %v1866_v45 = vmul.f32 1.442695, %v1819_v9 }
 0x290   :  { %v1718_v26 = vpop.xlane.xlu0 %1717  ;;  %v1944_v28 = vsel %vm1691_vm7, %v4686_v29, 0.0 }
 0x291   :  { %v1820_v47 = vsub.f32 %v4501_v37, %v1718_v26  ;;  %1945 = vadd.xlane.f32.xlu0 %v1944_v28  ;;  %1765 = vmax.xlane.f32.xlu1 %v1764_v24  ;;  %v1797_v37 = vsel %vm1691_vm7, %v4706_v55, -inf }
 0x293   :  { %v1868_v36 = vmul.f32 1.442695, %v1820_v47 }
 0x294   :  { %v1721_v17 = vpop.xlane.xlu1 %1720 }
 0x295   :  { %3715 = vpow2.f32 %v1868_v36  ;;  %1783 = vmax.xlane.f32.xlu1 %v1782_v31  ;;  %1786 = vmax.xlane.f32.xlu0 %v1785_v0  ;;  %v1821_v42 = vsub.f32 %v4511_v25, %v1721_v17  ;;  %v1463_v25 = vpop.f32.mrb[61].mxu0  ;;  %v1788_v36 = vsel %vm1691_vm7, %v4733_v46, -inf }
 0x296   :  { %3717 = vpow2.f32 %v1866_v45  ;;  %v3427_v23 = vpop.f32.mrb[62].mxu0 }
 0x297   :  { %v4714_v56 = vpop.eup %3711  ;;  %v1870_v33 = vmul.f32 1.442695, %v1821_v42  ;;  %v1466_v9 = vpop.f32.mrb[63].mxu0  ;;  %v2157_v0 = vpack.c.bf16 %v3427_v23, %v3426_v1  ;;  %v4755_v42 = vsel %vm4433_vm8, %v4658_v59, -1e+30 }
 0x298   :  { %v1724_v11 = vpop.xlane.xlu0 %1723  ;;  %v1950_v41 = vsel %vm1691_vm7, %v4714_v56, 0.0  ;;  %v4723_v34 = vpop.eup %3713  ;;  %v2156_v28 = vpack.c.bf16 %v1466_v9, %v1463_v25  ;;  %v4766_v1 = vsel %vm4419_vm5, %v4656_v32, -1e+30 }
 0x299   :  { %1798 = vmax.xlane.f32.xlu1 %v1797_v37  ;;  %1951 = vadd.xlane.f32.xlu0 %v1950_v41  ;;  %v1822_v16 = vsub.f32 %v4519_v5, %v1724_v11  ;;  %v1947_v49 = vsel %vm1691_vm7, %v4723_v34, 0.0  ;;  %3719 = vpow2.f32 %v1870_v33  ;;  %v4757_v11 = vpop.f32.mrb[64].mxu0  ;;  %v1806_v33 = vsel %vm1691_vm7, %v4755_v42, -inf }
 0x29a   :  { %3691 = vmatpush3.bf16.msra.mxu1 %v2156_v28  ;;  %3465 = vmatpush3.bf16.msra.mxu0 %v2156_v28 }
 0x29b   :  { %v1872_v5 = vmul.f32 1.442695, %v1822_v16  ;;  %3689 = vmatprep.subr.bf16.mxu1 %v5402_v51  ;;  %3466 = vmatprep.subr.bf16.mxu0 %v5402_v51 }
 0x29c   :  { %v1727_v40 = vpop.xlane.xlu1 %1726 }
 0x29d   :  { %1948 = vadd.xlane.f32.xlu1 %v1947_v49  ;;  %1801 = vmax.xlane.f32.xlu0 %v1800_v54  ;;  %v1823_v26 = vsub.f32 %v4527_v13, %v1727_v40  ;;  %v4747_v13 = vsel %vm4433_vm8, %v4620_v30, -1e+30  ;;  %3721 = vpow2.f32 %v1872_v5  ;;  %v1479_v54 = vpop.f32.mrb[65].mxu0  ;;  %v4781_v49 = vsel %vm4444_vm10, %v4630_v38, -1e+30 }
 0x29e   :  { %v1791_v41 = vsel %vm1691_vm7, %v4747_v13, -inf  ;;  %3692 = vmatpush3.bf16.msra.mxu1 %v2157_v0  ;;  %3467 = vmatpush3.bf16.msra.mxu0 %v2157_v0  ;;  %v2158_v59 = vpack.c.bf16 %v1479_v54, %v1479_v54 }
 0x29f   :  { %v4736_v24 = vpop.eup %3715  ;;  %v1874_v31 = vmul.f32 1.442695, %v1823_v26  ;;  %3690 = vmatprep.subr.bf16.mxu1 %v5402_v51  ;;  %3468 = vmatprep.subr.bf16.mxu0 %v5402_v51 }
 0x2a0   :  { %v1730_v47 = vpop.xlane.xlu0 %1729  ;;  %v1956_v45 = vsel %vm1691_vm7, %v4736_v24, 0.0  ;;  %v4742_v10 = vpop.eup %3717  ;;  %v2191_v58 = vsel %vm2189_vm15, %v2158_v59, 0 }
 0x2a1   :  { %v1824_v17 = vsub.f32 %v4536_v21, %v1730_v47  ;;  %1957 = vadd.xlane.f32.xlu0 %v1956_v45  ;;  %1789 = vmax.xlane.f32.xlu1 %v1788_v36  ;;  %v1953_v21 = vsel %vm1691_vm7, %v4742_v10, 0.0  ;;  %3723 = vpow2.f32 %v1874_v31  ;;  %v1794_v47 = vsel %vm1691_vm7, %v4781_v49, -inf  ;;  %v4798_v36 = vpop.f32.mrb[66].mxu0 }
 0x2a2   :  { %3693 = vmatpush3.bf16.msra.mxu1 %v2191_v58  ;;  %3469 = vmatpush3.bf16.msra.mxu0 %v2191_v58 }
 0x2a3   :  { %v1876_v37 = vmul.f32 1.442695, %v1824_v17  ;;  %v4776_v40 = vpop.eup %3719  ;;  %3482 = vmatprep.subr.bf16.mxu1 %v5402_v51  ;;  %3536 = vmatprep.subr.bf16.mxu0 %v5402_v51  ;;  %v4800_v17 = vpop.f32.mrb[67].mxu0 }
 0x2a4   :  { %v1733_v30 = vpop.xlane.xlu1 %1732  ;;  %v1959_v5 = vsel %vm1691_vm7, %v4776_v40, 0.0  ;;  %v4813_v54 = vpop.f32.mrb[68].mxu0 }
 0x2a5   :  { %v1825_v60 = vsub.f32 %v4542_v39, %v1733_v30  ;;  %1954 = vadd.xlane.f32.xlu1 %v1953_v21  ;;  %1792 = vmax.xlane.f32.xlu0 %v1791_v41  ;;  %3725 = vpow2.f32 %v1876_v37  ;;  %v1803_v39 = vsel %vm1691_vm7, %v4766_v1, -inf }
 0x2a7   :  { %v1878_v16 = vmul.f32 1.442695, %v1825_v60  ;;  %v4790_v38 = vpop.eup %3721  ;;  %v4815_v60 = vpop.f32.mrb[69].mxu0 }
 0x2a8   :  { %v1694_v32 = vpop.xlane.xlu1 %1693  ;;  %v1736_v25 = vpop.xlane.xlu0 %1735 }
 0x2a9   :  { %v1826_v23 = vsub.f32 %v4555_v2, %v1736_v25  ;;  %1804 = vmax.xlane.f32.xlu1 %v1803_v39  ;;  %1807 = vmax.xlane.f32.xlu0 %v1806_v33  ;;  %3727 = vpow2.f32 %v1878_v16  ;;  %v4795_v2 = vsel %vm4444_vm10, %v4660_v22, -1e+30  ;;  %v1812_v16 = vsub.f32 %v4549_v62, %v1694_v32 }
 0x2aa   :  { %v1809_v63 = vsel %vm1691_vm7, %v4795_v2, -inf }
 0x2ab   :  { %v1880_v9 = vmul.f32 1.442695, %v1826_v23  ;;  %v4804_v37 = vpop.eup %3723 }
 0x2ac   :  { %v1697_v26 = vpop.xlane.xlu0 %1696  ;;  %v1739_v28 = vpop.xlane.xlu1 %1738  ;;  %v1965_v39 = vsel %vm1691_vm7, %v4804_v37, 0.0 }
 0x2ad   :  { %v1827_v45 = vsub.f32 %v4568_v61, %v1739_v28  ;;  %1960 = vadd.xlane.f32.xlu1 %v1959_v5  ;;  %1795 = vmax.xlane.f32.xlu0 %v1794_v47  ;;  %3729 = vpow2.f32 %v1880_v9  ;;  %v1962_v61 = vsel %vm1691_vm7, %v4790_v38, 0.0  ;;  %v4827_v28 = vpop.f32.mrb[70].mxu0  ;;  %v1813_v62 = vsub.f32 %v4564_v15, %v1697_v26 }
 0x2ae   :  { %v4829_v5 = vpop.f32.mrb[71].mxu0 }
 0x2af   :  { %v1882_v31 = vmul.f32 1.442695, %v1827_v45  ;;  %v4810_v22 = vpop.eup %3725  ;;  %v1852_v45 = vmul.f32 1.442695, %v1812_v16  ;;  %v1854_v26 = vmul.f32 1.442695, %v1813_v62 }
 0x2b0   :  { %v1742_v30 = vpop.xlane.xlu0 %1741  ;;  %v1757_v21 = vpop.xlane.xlu1 %1756 }
 0x2b1   :  { %v1828_v41 = vsub.f32 %v4588_v53, %v1742_v30  ;;  %1810 = vmax.xlane.f32.xlu1 %v1809_v63  ;;  %1963 = vadd.xlane.f32.xlu0 %v1962_v61  ;;  %3731 = vpow2.f32 %v1882_v31  ;;  %v1968_v53 = vsel %vm1691_vm7, %v4810_v22, 0.0 }
 0x2b3   :  { %v1884_v59 = vmul.f32 1.442695, %v1828_v41  ;;  %v4824_v23 = vpop.eup %3727 }
 0x2b4   :  { %v1754_v58 = vpop.xlane.xlu0 %1753  ;;  %v1745_v25 = vpop.xlane.xlu1 %1744  ;;  %v1971_v63 = vsel %vm1691_vm7, %v4824_v23, 0.0 }
 0x2b5   :  { %3733 = vpow2.f32 %v1884_v59  ;;  %v1829_v9 = vsub.f32 %v4598_v4, %v1745_v25  ;;  %1966 = vadd.xlane.f32.xlu1 %v1965_v39  ;;  %1969 = vadd.xlane.f32.xlu0 %v1968_v53  ;;  %v1832_v41 = vsub.f32 %v4584_v50, %v1754_v58  ;;  %v1833_v25 = vsub.f32 %v4572_v35, %v1757_v21 }
 0x2b7   :  { %v1886_v32 = vmul.f32 1.442695, %v1829_v9  ;;  %v4832_v47 = vpop.eup %3729  ;;  %v1892_v62 = vmul.f32 1.442695, %v1832_v41  ;;  %v1894_v58 = vmul.f32 1.442695, %v1833_v25 }
 0x2b8   :  { %v1748_v31 = vpop.xlane.xlu0 %1747  ;;  %v1763_v30 = vpop.xlane.xlu1 %1762  ;;  %v1974_v4 = vsel %vm1691_vm7, %v4832_v47, 0.0 }
 0x2b9   :  { %v1830_v61 = vsub.f32 %v4616_v7, %v1748_v31  ;;  %1972 = vadd.xlane.f32.xlu1 %v1971_v63  ;;  %3735 = vpow2.f32 %v1886_v32  ;;  %1975 = vadd.xlane.f32.xlu0 %v1974_v4 }
 0x2ba   :  { %3737 = vpow2.f32 %v1852_v45 }
 0x2bb   :  { %v1888_v59 = vmul.f32 1.442695, %v1830_v61  ;;  %v4842_v16 = vpop.eup %3731  ;;  %v1835_v61 = vsub.f32 %v4602_v12, %v1763_v30 }
 0x2bc   :  { %v1760_v39 = vpop.xlane.xlu0 %1759  ;;  %v1751_v7 = vpop.xlane.xlu1 %1750  ;;  %v1977_v9 = vsel %vm1691_vm7, %v4842_v16, 0.0 }
 0x2bd   :  { %3739 = vpow2.f32 %v1888_v59  ;;  %v1831_v53 = vsub.f32 %v4626_v8, %v1751_v7  ;;  %1978 = vadd.xlane.f32.xlu1 %v1977_v9  ;;  %v1834_v8 = vsub.f32 %v4612_v20, %v1760_v39  ;;  %v4864_v39 = vpop.f32.mrb[72].mxu0  ;;  %v1898_v7 = vmul.f32 1.442695, %v1835_v61 }
 0x2be   :  { %3741 = vpow2.f32 %v1854_v26  ;;  %v4868_v30 = vpop.f32.mrb[73].mxu0 }
 0x2bf   :  { %v4848_v32 = vpop.eup %3733  ;;  %v1890_v50 = vmul.f32 1.442695, %v1831_v53  ;;  %v1896_v25 = vmul.f32 1.442695, %v1834_v8 }
 0x2c0   :  { %v1769_v31 = vpop.xlane.xlu0 %1768  ;;  %v1980_v45 = vsel %vm1691_vm7, %v4848_v32, 0.0 }
 0x2c1   :  { %v1837_v35 = vsub.f32 %v4634_v43, %v1769_v31  ;;  %1981 = vadd.xlane.f32.xlu0 %v1980_v45  ;;  %3743 = vpow2.f32 %v1890_v50  ;;  %v4875_v50 = vpop.f32.mrb[74].mxu0 }
 0x2c2   :  { %3745 = vpow2.f32 %v1892_v62 }
 0x2c3   :  { %v1902_v21 = vmul.f32 1.442695, %v1837_v35  ;;  %v4854_v63 = vpop.eup %3735  ;;  %3747 = vpow2.f32 %v1894_v58  ;;  %v4877_v58 = vpop.f32.mrb[75].mxu0 }
 0x2c4   :  { %5436 = vst [vmem:[#allocation8_spill] sm:$0xff] %v4854_v63  ;;  %v1772_v4 = vpop.xlane.xlu1 %1771  ;;  %v1983_v41 = vsel %vm1691_vm7, %v4854_v63, 0.0  ;;  %v4860_v59 = vpop.eup %3737 }
 0x2c5   :  { %v1838_v26 = vsub.f32 %v4640_v44, %v1772_v4  ;;  %1984 = vadd.xlane.f32.xlu1 %v1983_v41  ;;  %3749 = vpow2.f32 %v1902_v21  ;;  %v1932_v62 = vsel %vm1691_vm7, %v4860_v59, 0.0 }
 0x2c7   :  { %v4862_v43 = vpop.eup %3739  ;;  %v1904_v20 = vmul.f32 1.442695, %v1838_v26 }
 0x2c8   :  { %5437 = vst [vmem:[#allocation9_spill] sm:$0xff] %v4862_v43  ;;  %v1775_v53 = vpop.xlane.xlu0 %1774  ;;  %v1986_v12 = vsel %vm1691_vm7, %v4862_v43, 0.0  ;;  %v4870_v44 = vpop.eup %3741 }
 0x2c9   :  { %3751 = vpow2.f32 %v1904_v20  ;;  %v1839_v9 = vsub.f32 %v4646_v52, %v1775_v53  ;;  %1987 = vadd.xlane.f32.xlu0 %v1986_v12  ;;  %1933 = vadd.xlane.f32.xlu1 %v1932_v62  ;;  %v1935_v52 = vsel %vm1691_vm7, %v4870_v44, 0.0 }
 0x2ca   :  { %3753 = vpow2.f32 %v1896_v25 }
 0x2cb   :  { %v1906_v31 = vmul.f32 1.442695, %v1839_v9  ;;  %v4881_v35 = vpop.eup %3743  ;;  %3755 = vpow2.f32 %v1898_v7 }
 0x2cc   :  { %5438 = vst [vmem:[#allocation10_spill] sm:$0xff] %v4881_v35  ;;  %v1778_v8 = vpop.xlane.xlu1 %1777  ;;  %v4885_v21 = vpop.eup %3745  ;;  %v1989_v4 = vsel %vm1691_vm7, %v4881_v35, 0.0 }
 0x2cd   :  { %5439 = vst [vmem:[#allocation11_spill] sm:$0xff] %v4885_v21  ;;  %v1840_v61 = vsub.f32 %v4652_v3, %v1778_v8  ;;  %1936 = vadd.xlane.f32.xlu0 %v1935_v52  ;;  %v4890_v26 = vpop.eup %3747  ;;  %1990 = vadd.xlane.f32.xlu1 %v1989_v4  ;;  %3757 = vpow2.f32 %v1906_v31  ;;  %v1992_v25 = vsel %vm1691_vm7, %v4885_v21, 0.0 }
 0x2ce   :  { %5440 = vst [vmem:[#allocation12_spill] sm:$0xff] %v4890_v26  ;;  %v1995_v7 = vsel %vm1691_vm7, %v4890_v26, 0.0 }
 0x2cf   :  { %v1908_v41 = vmul.f32 1.442695, %v1840_v61  ;;  %v4894_v20 = vpop.eup %3749 }
 0x2d0   :  { %5441 = vst [vmem:[#allocation13_spill] sm:$0xff] %v4894_v20  ;;  %v2007_v12 = vsel %vm1691_vm7, %v4894_v20, 0.0 }
 0x2d1   :  { %3759 = vpow2.f32 %v1908_v41  ;;  %1993 = vadd.xlane.f32.xlu0 %v1992_v25  ;;  %1996 = vadd.xlane.f32.xlu1 %v1995_v7  ;;  %v4920_v25 = vpop.f32.mrb[76].mxu0 }
 0x2d2   :  { %v4922_v7 = vpop.f32.mrb[77].mxu0 }
 0x2d3   :  { %v4898_v3 = vpop.eup %3751 }
 0x2d4   :  { %5442 = vst [vmem:[#allocation14_spill] sm:$0xff] %v4898_v3  ;;  %v2010_v53 = vsel %vm1691_vm7, %v4898_v3, 0.0  ;;  %v4904_v9 = vpop.eup %3753 }
 0x2d5   :  { %5443 = vst [vmem:[#allocation15_spill] sm:$0xff] %v4904_v9  ;;  %2008 = vadd.xlane.f32.xlu0 %v2007_v12  ;;  %v4906_v62 = vpop.eup %3755  ;;  %2011 = vadd.xlane.f32.xlu1 %v2010_v53  ;;  %v1998_v31 = vsel %vm1691_vm7, %v4904_v9, 0.0  ;;  %v4926_v12 = vpop.f32.mrb[78].mxu0 }
 0x2d6   :  { %5444 = vst [vmem:[#allocation16_spill] sm:$0xff] %v4906_v62  ;;  %v2001_v52 = vsel %vm1691_vm7, %v4906_v62, 0.0 }
 0x2d7   :  { %v4910_v8 = vpop.eup %3757 }
 0x2d8   :  { %5445 = vst [vmem:[#allocation17_spill] sm:$0xff] %v4910_v8  ;;  %v2013_v41 = vsel %vm1691_vm7, %v4910_v8, 0.0 }
 0x2d9   :  { %1999 = vadd.xlane.f32.xlu0 %v1998_v31  ;;  %2002 = vadd.xlane.f32.xlu1 %v2001_v52  ;;  %v4928_v31 = vpop.f32.mrb[79].mxu0 }
 0x2da   :  { %v4932_v45 = vpop.f32.mrb[80].mxu0 }
 0x2db   :  { %v4914_v61 = vpop.eup %3759  ;;  %5447 = vst [vmem:[#allocation19_spill] sm:$0xff] %v4932_v45  ;;  %v4934_v15 = vpop.f32.mrb[81].mxu0 }
 0x2dc   :  { %5446 = vst [vmem:[#allocation18_spill] sm:$0xff] %v4914_v61  ;;  %v2016_v4 = vsel %vm1691_vm7, %v4914_v61, 0.0 }
 0x2dd   :  { %2014 = vadd.xlane.f32.xlu0 %v2013_v41  ;;  %2017 = vadd.xlane.f32.xlu1 %v2016_v4  ;;  %v4936_v41 = vpop.f32.mrb[82].mxu0 }
 0x2de   :  { %5448 = vst [vmem:[#allocation20_spill] sm:$0xff] %v4936_v41  ;;  %v4938_v33 = vpop.f32.mrb[83].mxu0 }
 0x2df   :  { %v4944_v51 = vpop.f32.mrb[84].mxu0 }
 0x2e0   :  { %v4946_v0 = vpop.f32.mrb[85].mxu0 }
 0x2e1   :  { %v4948_v61 = vpop.f32.mrb[86].mxu0 }
 0x2e2   :  { %5449 = vst [vmem:[#allocation21_spill] sm:$0xff] %v4948_v61  ;;  %v4950_v52 = vpop.f32.mrb[87].mxu0 }
 0x2e3   :  { %5450 = vst [vmem:[#allocation22_spill] sm:$0xff] %v4950_v52  ;;  %v4954_v20 = vpop.f32.mrb[88].mxu0 }
 0x2e4   :  { %5451 = vst [vmem:[#allocation23_spill] sm:$0xff] %v4954_v20  ;;  %v4956_v3 = vpop.f32.mrb[89].mxu0 }
 0x2e5   :  { %5452 = vst [vmem:[#allocation24_spill] sm:$0xff] %v4956_v3  ;;  %v4960_v62 = vpop.f32.mrb[90].mxu0 }
 0x2e6   :  { %5453 = vst [vmem:[#allocation25_spill] sm:$0xff] %v4960_v62  ;;  %v4964_v9 = vpop.f32.mrb[91].mxu0 }
 0x2e7   :  { %5454 = vst [vmem:[#allocation26_spill] sm:$0xff] %v4964_v9  ;;  %v4966_v35 = vpop.f32.mrb[92].mxu0 }
 0x2e8   :  { %5455 = vst [vmem:[#allocation27_spill] sm:$0xff] %v4966_v35  ;;  %v4968_v63 = vpop.f32.mrb[93].mxu0 }
 0x2e9   :  { %5456 = vst [vmem:[#allocation28_spill] sm:$0xff] %v4968_v63  ;;  %v4970_v21 = vpop.f32.mrb[94].mxu0 }
 0x2ea   :  { %v4972_v8 = vpop.f32.mrb[95].mxu0 }
 0x2eb   :  { %5457 = vst [vmem:[#allocation29_spill] sm:$0xff] %v4972_v8 }
 0x316   :  { %v1940_v45 = vpop.xlane.xlu0 %1939 }
 0x317   :  { %3761 = vrcp.f32 %v1940_v45 }
 0x31a   :  { %v1781_v4 = vpop.xlane.xlu0 %1780  ;;  %v1943_v61 = vpop.xlane.xlu1 %1942 }
 0x31b   :  { %v1841_v3 = vsub.f32 %v4672_v18, %v1781_v4  ;;  %3763 = vrcp.f32 %v1943_v61 }
 0x31d   :  { %v1910_v53 = vmul.f32 1.442695, %v1841_v3 }
 0x31e   :  { %v1946_v20 = vpop.xlane.xlu0 %1945  ;;  %v1766_v62 = vpop.xlane.xlu1 %1765 }
 0x31f   :  { %3765 = vpow2.f32 %v1910_v53  ;;  %v1836_v35 = vsub.f32 %v4684_v57, %v1766_v62 }
 0x320   :  { %3767 = vrcp.f32 %v1946_v20 }
 0x321   :  { %v1900_v41 = vmul.f32 1.442695, %v1836_v35  ;;  %v3762_v52 = vpop.eup %3761 }
 0x322   :  { %v1784_v9 = vpop.xlane.xlu1 %1783  ;;  %v1787_v43 = vpop.xlane.xlu0 %1786  ;;  %v2094_v3 = vmul.f32 %v3762_v52, %v4665_v6 }
 0x323   :  { %3769 = vpow2.f32 %v1900_v41  ;;  %v1842_v26 = vsub.f32 %v4696_v19, %v1784_v9  ;;  %v1843_v45 = vsub.f32 %v4701_v48, %v1787_v43  ;;  %v2161_v9 = vpack.c.bf16 %v4829_v5, %v4829_v5 }
 0x325   :  { %v3764_v63 = vpop.eup %3763  ;;  %v1912_v8 = vmul.f32 1.442695, %v1842_v26  ;;  %v1914_v18 = vmul.f32 1.442695, %v1843_v45 }
 0x326   :  { %v2095_v61 = vmul.f32 %v3764_v63, %v4675_v27  ;;  %v1799_v53 = vpop.xlane.xlu1 %1798  ;;  %v1952_v4 = vpop.xlane.xlu0 %1951  ;;  %v5459_v63 = vmov 0.0  }
 0x327   :  { %3771 = vpow2.f32 %v1912_v8  ;;  %v1847_v57 = vsub.f32 %v4706_v55, %v1799_v53  ;;  %v5458_v55 = vpack.c.bf16 %v4757_v11, %v4800_v17 }
 0x328   :  { %v2133_v35 = vpack.c.bf16 %v2095_v61, %v2094_v3  ;;  %3773 = vpow2.f32 %v1914_v18  ;;  %v2259_v18 = vsel %vm2189_vm15, %v2161_v9, 0 }
 0x329   :  { %v4983_v20 = vpop.eup %3765  ;;  %v1922_v62 = vmul.f32 1.442695, %v1847_v57  ;;  %3775 = vrcp.f32 %v1952_v4 }
 0x32a   :  { %v3768_v19 = vpop.eup %3767  ;;  %v1949_v48 = vpop.xlane.xlu1 %1948  ;;  %3475 = vmatmul.mubr.msk.bf16.vlgmr.msra.gmra.mrb[60].mxu1 %vm1691_vm7, %v2133_v35  ;;  %v2019_v6 = vsel %vm1691_vm7, %v4983_v20, 0.0 }
 0x32b   :  { %v1802_v43 = vpop.xlane.xlu0 %1801  ;;  %3777 = vpow2.f32 %v1922_v62  ;;  %2020 = vadd.xlane.f32.xlu1 %v2019_v6  ;;  %3483 = vmatpush3.bf16.msra.mxu1 %v5458_v55  ;;  %v2096_v26 = vmul.f32 %v3768_v19, %v4686_v29  ;;  %v5460_v29 = vpack.c.bf16 %v4815_v60, %v4798_v36 }
 0x32c   :  { %v1848_v27 = vsub.f32 %v4719_v14, %v1802_v43  ;;  %3779 = vrcp.f32 %v1949_v48  ;;  %3478 = vmatprep.mubr.msk.bf16.mxu1 %vm3919_vm2, %v5459_v63  ;;  %3484 = vmatprep.subr.bf16.mxu1 %v5459_v63 }
 0x32d   :  { %v4998_v8 = vpop.eup %3769  ;;  %v2134_v45 = vpack.c.bf16 %v2096_v26, %v2096_v26 }
 0x32e   :  { %v1924_v52 = vmul.f32 1.442695, %v1848_v27  ;;  %v1790_v41 = vpop.xlane.xlu1 %1789  ;;  %v2004_v11 = vsel %vm1691_vm7, %v4998_v8, 0.0 }
 0x32f   :  { %v1958_v14 = vpop.xlane.xlu0 %1957  ;;  %v1844_v17 = vsub.f32 %v4733_v46, %v1790_v41  ;;  %2005 = vadd.xlane.f32.xlu0 %v2004_v11  ;;  %3485 = vmatpush3.bf16.msra.mxu1 %v5460_v29  ;;  %v5031_v11 = vpop.f32.mrb[96].mxu0 }
 0x330   :  { %3781 = vpow2.f32 %v1924_v52  ;;  %3486 = vmatprep.subr.bf16.mxu1 %v5459_v63 }
 0x331   :  { %v5008_v5 = vpop.eup %3771  ;;  %v1916_v3 = vmul.f32 1.442695, %v1844_v17  ;;  %3783 = vrcp.f32 %v1958_v14 }
 0x332   :  { %v5010_v61 = vpop.eup %3773  ;;  %v1955_v53 = vpop.xlane.xlu1 %1954  ;;  %3479 = vmatmul.mubr.msk.bf16.gmra.mrb[64].mxu1 %vm1691_vm7, %v2134_v45  ;;  %v2022_v46 = vsel %vm1691_vm7, %v5008_v5, 0.0  ;;  %v5461_v45 = vpack.c.bf16 %v4827_v28, %v4813_v54 }
 0x333   :  { %v1793_v4 = vpop.xlane.xlu0 %1792  ;;  %v3776_v36 = vpop.eup %3775  ;;  %3785 = vpow2.f32 %v1916_v3  ;;  %v2025_v57 = vsel %vm1691_vm7, %v5010_v61, 0.0  ;;  %2023 = vadd.xlane.f32.xlu0 %v2022_v46  ;;  %3487 = vmatpush3.bf16.msra.mxu1 %v2259_v18 }
 0x334   :  { %v1845_v60 = vsub.f32 %v4747_v13, %v1793_v4  ;;  %3787 = vrcp.f32 %v1955_v53  ;;  %2026 = vadd.xlane.f32.xlu1 %v2025_v57  ;;  %3488 = vmatprep.mubr.msk.bf16.mxu1 %vm3919_vm2, %v5459_v63  ;;  %v2098_v48 = vmul.f32 %v3776_v36, %v4714_v56  ;;  %v2164_v53 = vpack.c.bf16 %v4864_v39, %v4864_v39 }
 0x335   :  { %v5020_v35 = vpop.eup %3777  ;;  %3500 = vmatprep.subr.bf16.mxu1 %v5459_v63  ;;  %v5462_v39 = vpack.c.bf16 %v4877_v58, %v4868_v30 }
 0x336   :  { %v1918_v62 = vmul.f32 1.442695, %v1845_v60  ;;  %v3780_v19 = vpop.eup %3779  ;;  %v1805_v43 = vpop.xlane.xlu1 %1804  ;;  %v2037_v6 = vsel %vm1691_vm7, %v5020_v35, 0.0 }
 0x337   :  { %v1808_v13 = vpop.xlane.xlu0 %1807  ;;  %v2097_v27 = vmul.f32 %v3780_v19, %v4723_v34  ;;  %v1849_v55 = vsub.f32 %v4766_v1, %v1805_v43  ;;  %2038 = vadd.xlane.f32.xlu0 %v2037_v6 }
 0x338   :  { %3789 = vpow2.f32 %v1918_v62  ;;  %v1850_v26 = vsub.f32 %v4755_v42, %v1808_v13  ;;  %v5037_v42 = vpop.f32.mrb[97].mxu0 }
 0x339   :  { %v2135_v52 = vpack.c.bf16 %v2098_v48, %v2097_v27  ;;  %v1926_v14 = vmul.f32 1.442695, %v1849_v55  ;;  %v2177_v18 = vpack.c.bf16 %v5037_v42, %v4970_v21  ;;  %v5051_v4 = vpop.f32.mrb[98].mxu0 }
 0x33a   :  { %v5029_v9 = vpop.eup %3781  ;;  %v1928_v41 = vmul.f32 1.442695, %v1850_v26  ;;  %v1961_v56 = vpop.xlane.xlu1 %1960 }
 0x33b   :  { %v1796_v17 = vpop.xlane.xlu0 %1795  ;;  %v2040_v29 = vsel %vm1691_vm7, %v5029_v9, 0.0  ;;  %3791 = vpow2.f32 %v1926_v14  ;;  %3489 = vmatmul.mubr.msk.bf16.vlgmr.msra.gmra.mrb[68].mxu1 %vm1691_vm7, %v2135_v52  ;;  %v3784_v1 = vpop.eup %3783 }
 0x33c   :  { %v1846_v34 = vsub.f32 %v4781_v49, %v1796_v17  ;;  %2041 = vadd.xlane.f32.xlu1 %v2040_v29  ;;  %3793 = vpow2.f32 %v1928_v41  ;;  %3492 = vmatprep.mubr.msk.bf16.mxu1 %vm3919_vm2, %v5459_v63  ;;  %v2100_v62 = vmul.f32 %v3784_v1, %v4736_v24  ;;  %v5058_v19 = vpop.f32.mrb[99].mxu0 }
 0x33d   :  { %3501 = vmatpush3.bf16.msra.mxu1 %v5461_v45  ;;  %v5046_v3 = vpop.eup %3785  ;;  %3795 = vrcp.f32 %v1961_v56  ;;  %v2178_v48 = vpack.c.bf16 %v5031_v11, %v5058_v19 }
 0x33e   :  { %v1920_v49 = vmul.f32 1.442695, %v1846_v34  ;;  %3502 = vmatprep.subr.bf16.mxu1 %v5459_v63  ;;  %v3788_v46 = vpop.eup %3787  ;;  %v1811_v36 = vpop.xlane.xlu1 %1810  ;;  %v2028_v54 = vsel %vm1691_vm7, %v5046_v3, 0.0 }
 0x33f   :  { %v1851_v28 = vsub.f32 %v4795_v2, %v1811_v36  ;;  %v1964_v60 = vpop.xlane.xlu0 %1963  ;;  %2029 = vadd.xlane.f32.xlu0 %v2028_v54  ;;  %v2099_v57 = vmul.f32 %v3788_v46, %v4742_v10  ;;  %v2327_v2 = vsel %vm2189_vm15, %v2164_v53, 0 }
 0x340   :  { %3797 = vpow2.f32 %v1920_v49 }
 0x341   :  { %3503 = vmatpush3.bf16.msra.mxu1 %v5462_v39  ;;  %v1930_v13 = vmul.f32 1.442695, %v1851_v28  ;;  %v2136_v6 = vpack.c.bf16 %v2100_v62, %v2099_v57  ;;  %3799 = vrcp.f32 %v1964_v60  ;;  %v5463_v39 = vpack.c.bf16 %v4922_v7, %v4875_v50 }
 0x342   :  { %v5065_v43 = vpop.eup %3789  ;;  %3504 = vmatprep.subr.bf16.mxu1 %v5459_v63  ;;  %v1967_v10 = vpop.xlane.xlu1 %1966 }
 0x343   :  { %v2031_v24 = vsel %vm1691_vm7, %v5065_v43, 0.0  ;;  %3801 = vpow2.f32 %v1930_v13  ;;  %3493 = vmatmul.mubr.msk.bf16.gmra.mrb[72].mxu1 %vm1691_vm7, %v2136_v6  ;;  %v1970_v14 = vpop.xlane.xlu0 %1969  ;;  %v2167_v13 = vpack.c.bf16 %v4926_v12, %v4926_v12 }
 0x344   :  { %2032 = vadd.xlane.f32.xlu1 %v2031_v24  ;;  %3803 = vrcp.f32 %v1967_v10  ;;  %3496 = vmatprep.mubr.msk.bf16.mxu1 %vm3919_vm2, %v5459_v63  ;;  %v5464_v10 = vpack.c.bf16 %v4920_v25, %v4928_v31 }
 0x345   :  { %3505 = vmatpush3.bf16.msra.mxu1 %v2327_v2  ;;  %v5074_v30 = vpop.eup %3791  ;;  %v2395_v24 = vsel %vm2189_vm15, %v2167_v13, 0  ;;  %v5473_v13 = vld [vmem:[#allocation12_spill] sm:$0xff] }
 0x346   :  { %3518 = vmatprep.subr.bf16.mxu1 %v5459_v63  ;;  %v5077_v58 = vpop.eup %3793  ;;  %v1973_v27 = vpop.xlane.xlu1 %1972  ;;  %v2043_v55 = vsel %vm1691_vm7, %v5074_v30, 0.0 }
 0x347   :  { %v3796_v26 = vpop.eup %3795  ;;  %v2046_v52 = vsel %vm1691_vm7, %v5077_v58, 0.0  ;;  %2044 = vadd.xlane.f32.xlu0 %v2043_v55  ;;  %3805 = vrcp.f32 %v1973_v27  ;;  %v1976_v49 = vpop.xlane.xlu0 %1975 }
 0x348   :  { %2047 = vadd.xlane.f32.xlu1 %v2046_v52  ;;  %v2101_v41 = vmul.f32 %v3796_v26, %v4776_v40  ;;  %3807 = vrcp.f32 %v1970_v14 }
 0x349   :  { %3809 = vrcp.f32 %v1976_v49 }
 0x34a   :  { %v5084_v56 = vpop.eup %3797  ;;  %v2137_v17 = vpack.c.bf16 %v2101_v41, %v2101_v41  ;;  %v1979_v36 = vpop.xlane.xlu1 %1978 }
 0x34b   :  { %v2034_v29 = vsel %vm1691_vm7, %v5084_v56, 0.0  ;;  %v3800_v34 = vpop.eup %3799 }
 0x34c   :  { %2035 = vadd.xlane.f32.xlu0 %v2034_v29  ;;  %3497 = vmatmul.mubr.msk.bf16.gmra.mrb[76].mxu1 %vm1691_vm7, %v2137_v17  ;;  %v2102_v53 = vmul.f32 %v3800_v34, %v4790_v38 }
 0x34d   :  { %v5089_v1 = vpop.eup %3801  ;;  %3506 = vmatprep.mubr.msk.bf16.mxu1 %vm3919_vm2, %v5459_v63 }
 0x34e   :  { %v3804_v45 = vpop.eup %3803  ;;  %v2049_v40 = vsel %vm1691_vm7, %v5089_v1, 0.0  ;;  %v1982_v28 = vpop.xlane.xlu0 %1981 }
 0x34f   :  { %v2103_v46 = vmul.f32 %v3804_v45, %v4804_v37  ;;  %2050 = vadd.xlane.f32.xlu1 %v2049_v40  ;;  %3811 = vrcp.f32 %v1982_v28  ;;  %v5466_v28 = vld [vmem:[#allocation22_spill] sm:$0xff] }
 0x351   :  { %v2138_v54 = vpack.c.bf16 %v2103_v46, %v2102_v53  ;;  %v3806_v60 = vpop.eup %3805 }
 0x352   :  { %v1985_v57 = vpop.xlane.xlu1 %1984  ;;  %v3808_v62 = vpop.eup %3807  ;;  %v2105_v37 = vmul.f32 %v3806_v60, %v4824_v23  ;;  %v5467_v60 = vpack.c.bf16 %v4944_v51, %v5466_v28  ;;  %v5475_v51 = vld [vmem:[#allocation8_spill] sm:$0xff] }
 0x353   :  { %v2104_v2 = vmul.f32 %v3808_v62, %v4810_v22  ;;  %v3810_v23 = vpop.eup %3809 }
 0x354   :  { %3507 = vmatmul.mubr.msk.bf16.vlgmr.msra.gmra.mrb[80].mxu1 %vm1691_vm7, %v2138_v54  ;;  %v2106_v25 = vmul.f32 %v3810_v23, %v4832_v47 }
 0x355   :  { %3510 = vmatprep.mubr.msk.bf16.mxu1 %vm3919_vm2, %v5459_v63  ;;  %3519 = vmatpush3.bf16.msra.mxu1 %v5463_v39  ;;  %v2139_v7 = vpack.c.bf16 %v2105_v37, %v2104_v2  ;;  %v5470_v39 = vld [vmem:[#allocation20_spill] sm:$0xff]  ;;  %v5474_v2 = vld [vmem:[#allocation11_spill] sm:$0xff] }
 0x356   :  { %v1988_v38 = vpop.xlane.xlu0 %1987  ;;  %3520 = vmatprep.subr.bf16.mxu1 %v5459_v63  ;;  %v1934_v6 = vpop.xlane.xlu1 %1933  ;;  %v2140_v26 = vpack.c.bf16 %v2106_v25, %v2106_v25 }
 0x357   :  { %3813 = vrcp.f32 %v1934_v6 }
 0x358   :  { %3815 = vrcp.f32 %v1979_v36 }
 0x359   :  { %3521 = vmatpush3.bf16.msra.mxu1 %v5464_v10  ;;  %v3812_v27 = vpop.eup %3811 }
 0x35a   :  { %v1937_v50 = vpop.xlane.xlu0 %1936  ;;  %3522 = vmatprep.subr.bf16.mxu1 %v5459_v63  ;;  %v1991_v12 = vpop.xlane.xlu1 %1990  ;;  %v2108_v47 = vmul.f32 %v3812_v27, %v4848_v32  ;;  %v5465_v32 = vpack.c.bf16 %v4938_v33, %v4934_v15  ;;  %v5468_v33 = vld [vmem:[#allocation9_spill] sm:$0xff] }
 0x35b   :  { %3817 = vrcp.f32 %v1937_v50 }
 0x35c   :  { %3511 = vmatmul.mubr.msk.bf16.gmra.mrb[84].mxu1 %vm1691_vm7, %v2139_v7  ;;  %3819 = vrcp.f32 %v1985_v57  ;;  %v5476_v7 = vld [vmem:[#allocation24_spill] sm:$0xff] }
 0x35d   :  { %3514 = vmatprep.mubr.msk.bf16.mxu1 %vm3919_vm2, %v5459_v63  ;;  %3523 = vmatpush3.bf16.msra.mxu1 %v2395_v24  ;;  %3821 = vrcp.f32 %v1988_v38  ;;  %v5471_v38 = vld [vmem:[#allocation19_spill] sm:$0xff]  ;;  %v5477_v24 = vld [vmem:[#allocation21_spill] sm:$0xff] }
 0x35e   :  { %v1994_v22 = vpop.xlane.xlu0 %1993  ;;  %3554 = vmatprep.subr.bf16.mxu1 %v5459_v63  ;;  %v1997_v31 = vpop.xlane.xlu1 %1996  ;;  %v5472_v37 = vpack.c.bf16 %v5470_v39, %v5471_v38  ;;  %v5478_v23 = vpack.c.bf16 %v5476_v7, %v5477_v24 }
 0x35f   :  { %3823 = vrcp.f32 %v1994_v22 }
 0x360   :  { %3825 = vrcp.f32 %v1997_v31 }
 0x361   :  { %v3814_v52 = vpop.eup %3813  ;;  %3827 = vrcp.f32 %v1991_v12 }
 0x362   :  { %v2009_v55 = vpop.xlane.xlu0 %2008  ;;  %v2012_v14 = vpop.xlane.xlu1 %2011  ;;  %v2092_v29 = vmul.f32 %v3814_v52, %v4860_v59  ;;  %v2170_v59 = vpack.c.bf16 %v4946_v0, %v4946_v0  ;;  %v5469_v0 = vld [vmem:[#allocation26_spill] sm:$0xff] }
 0x363   :  { %v3816_v41 = vpop.eup %3815  ;;  %v2173_v57 = vpack.c.bf16 %v5469_v0, %v5469_v0  ;;  %v5490_v0 = vld [vmem:[#allocation13_spill] sm:$0xff] }
 0x364   :  { %3515 = vmatmul.mubr.msk.bf16.gmra.mrb[88].mxu1 %vm1691_vm7, %v2140_v26  ;;  %v2107_v49 = vmul.f32 %v3816_v41, %v4842_v16  ;;  %v2463_v62 = vsel %vm2189_vm15, %v2170_v59, 0  ;;  %v5486_v59 = vld [vmem:[#allocation29_spill] sm:$0xff] }
 0x365   :  { %v3818_v17 = vpop.eup %3817  ;;  %3524 = vmatprep.mubr.msk.bf16.mxu1 %vm3919_vm2, %v5459_v63  ;;  %v2531_v22 = vsel %vm2189_vm15, %v2173_v57, 0 }
 0x366   :  { %v2093_v34 = vmul.f32 %v3818_v17, %v4870_v44  ;;  %v2000_v45 = vpop.xlane.xlu0 %1999  ;;  %v2003_v53 = vpop.xlane.xlu1 %2002  ;;  %v2141_v36 = vpack.c.bf16 %v2108_v47, %v2107_v49  ;;  %v5480_v17 = vld [vmem:[#allocation25_spill] sm:$0xff]  ;;  %v5481_v47 = vld [vmem:[#allocation23_spill] sm:$0xff]  ;;  %v5484_v49 = vld [vmem:[#allocation16_spill] sm:$0xff] }
 0x367   :  { %v3820_v46 = vpop.eup %3819  ;;  %3829 = vrcp.f32 %v2000_v45 }
 0x368   :  { %v2132_v40 = vpack.c.bf16 %v2093_v34, %v2092_v29  ;;  %v3822_v54 = vpop.eup %3821  ;;  %3831 = vrcp.f32 %v2003_v53  ;;  %v2109_v50 = vmul.f32 %v3820_v46, %v5475_v51  ;;  %v5482_v29 = vpack.c.bf16 %v5480_v17, %v5481_v47  ;;  %v5483_v34 = vld [vmem:[#allocation15_spill] sm:$0xff] }
 0x369   :  { %v3824_v16 = vpop.eup %3823  ;;  %v2110_v15 = vmul.f32 %v3822_v54, %v5468_v33  ;;  %3833 = vrcp.f32 %v2009_v55  ;;  %v5485_v53 = vld [vmem:[#allocation27_spill] sm:$0xff]  ;;  %v5489_v33 = vld [vmem:[#allocation14_spill] sm:$0xff] }
 0x36a   :  { %3471 = vmatmul.mubr.msk.bf16.vlgmr.msra.gmra.mrb[100].mxu0 %vm1691_vm7, %v2132_v40  ;;  %v3826_v44 = vpop.eup %3825  ;;  %v2112_v10 = vmul.f32 %v3824_v16, %v5474_v2  ;;  %3835 = vrcp.f32 %v2012_v14  ;;  %v2015_v26 = vpop.xlane.xlu0 %2014  ;;  %v5479_v14 = vld [vmem:[#allocation10_spill] sm:$0xff]  ;;  %v2176_v46 = vpack.c.bf16 %v5485_v53, %v5485_v53  ;;  %v5487_v16 = vld [vmem:[#allocation28_spill] sm:$0xff] }
 0x36b   :  { %3537 = vmatpush3.bf16.msra.mxu0 %v5465_v32  ;;  %3542 = vmatprep.mubr.msk.bf16.mxu0 %vm3919_vm2, %v5459_v63  ;;  %v2113_v6 = vmul.f32 %v3826_v44, %v5473_v13  ;;  %v2142_v12 = vpack.c.bf16 %v2110_v15, %v2109_v50  ;;  %v3828_v25 = vpop.eup %3827  ;;  %v2018_v52 = vpop.xlane.xlu1 %2017  ;;  %3837 = vrcp.f32 %v2015_v26  ;;  %v5488_v44 = vpack.c.bf16 %v5486_v59, %v5487_v16 }
 0x36c   :  { %3525 = vmatmul.mubr.msk.bf16.vlgmr.msra.gmra.mrb[92].mxu1 %vm1691_vm7, %v2141_v36  ;;  %3538 = vmatprep.subr.bf16.mxu0 %v5459_v63  ;;  %v2111_v41 = vmul.f32 %v3828_v25, %v5479_v14  ;;  %3839 = vrcp.f32 %v2018_v52 }
 0x36d   :  { %3528 = vmatprep.mubr.msk.bf16.mxu1 %vm3919_vm2, %v5459_v63  ;;  %3555 = vmatpush3.bf16.msra.mxu1 %v5467_v60  ;;  %v2144_v27 = vpack.c.bf16 %v2113_v6, %v2112_v10  ;;  %v2599_v60 = vsel %vm2189_vm15, %v2176_v46, 0  ;;  %v5492_v6 = vld [vmem:[#allocation18_spill] sm:$0xff]  ;;  %v2179_v10 = vpack.c.bf16 %v5051_v4, %v5051_v4 }
 0x36e   :  { %3556 = vmatprep.subr.bf16.mxu1 %v5459_v63  ;;  %v2143_v54 = vpack.c.bf16 %v2111_v41, %v2111_v41 }
 0x36f   :  { %3539 = vmatpush3.bf16.msra.mxu0 %v5472_v37  ;;  %v5491_v37 = vld [vmem:[#allocation17_spill] sm:$0xff]  ;;  %v2667_v50 = vsel %vm2189_vm15, %v2179_v10, 0 }
 0x370   :  { %3540 = vmatprep.subr.bf16.mxu0 %v5459_v63 }
 0x371   :  { %3557 = vmatpush3.bf16.msra.mxu1 %v5478_v23  ;;  %v3830_v31 = vpop.eup %3829 }
 0x372   :  { %3558 = vmatprep.subr.bf16.mxu1 %v5459_v63  ;;  %v3832_v55 = vpop.eup %3831  ;;  %v2114_v45 = vmul.f32 %v3830_v31, %v5483_v34 }
 0x373   :  { %3541 = vmatpush3.bf16.msra.mxu0 %v2463_v62  ;;  %v2115_v40 = vmul.f32 %v3832_v55, %v5484_v49  ;;  %v3834_v36 = vpop.eup %3833 }
 0x374   :  { %3529 = vmatmul.mubr.msk.bf16.gmra.mrb[96].mxu1 %vm1691_vm7, %v2142_v12  ;;  %3572 = vmatprep.subr.bf16.mxu0 %v5459_v63  ;;  %v3836_v32 = vpop.eup %3835  ;;  %v2117_v57 = vmul.f32 %v3834_v36, %v5490_v0 }
 0x375   :  { %3532 = vmatprep.mubr.msk.bf16.mxu1 %vm3919_vm2, %v5459_v63  ;;  %3559 = vmatpush3.bf16.msra.mxu1 %v2531_v22  ;;  %v2145_v28 = vpack.c.bf16 %v2115_v40, %v2114_v45  ;;  %v2118_v15 = vmul.f32 %v3836_v32, %v5489_v33  ;;  %v3838_v62 = vpop.eup %3837 }
 0x376   :  { %3543 = vmatmul.mubr.msk.bf16.vlgmr.msra.gmra.mrb[104].mxu0 %vm1691_vm7, %v2144_v27  ;;  %3590 = vmatprep.subr.bf16.mxu1 %v5459_v63  ;;  %v3840_v38 = vpop.eup %3839  ;;  %v2119_v13 = vmul.f32 %v3838_v62, %v5491_v37 }
 0x377   :  { %3546 = vmatprep.mubr.msk.bf16.mxu0 %vm3919_vm2, %v5459_v63  ;;  %3573 = vmatpush3.bf16.msra.mxu0 %v5482_v29  ;;  %v2147_v39 = vpack.c.bf16 %v2118_v15, %v2117_v57  ;;  %v2120_v2 = vmul.f32 %v3840_v38, %v5492_v6 }
 0x378   :  { %3574 = vmatprep.subr.bf16.mxu0 %v5459_v63 }
 0x379   :  { %v2148_v51 = vpack.c.bf16 %v2120_v2, %v2119_v13 }
 0x37b   :  { %3575 = vmatpush3.bf16.msra.mxu0 %v5488_v44 }
 0x37c   :  { %3533 = vmatmul.mubr.msk.bf16.gmra.mrb[100].mxu1 %vm1691_vm7, %v2143_v54  ;;  %3576 = vmatprep.subr.bf16.mxu0 %v5459_v63 }
 0x37d   :  { %3560 = vmatprep.mubr.msk.bf16.mxu1 %vm3919_vm2, %v5459_v63 }
 0x37e   :  { %3547 = vmatmul.mubr.msk.bf16.gmra.mrb[108].mxu0 %vm1691_vm7, %v2145_v28 }
 0x37f   :  { %3577 = vmatpush3.bf16.msra.mxu0 %v2599_v60  ;;  %3550 = vmatprep.mubr.msk.bf16.mxu0 %vm3919_vm2, %v5459_v63 }
 0x384   :  { %3561 = vmatmul.mubr.msk.bf16.vlgmr.msra.gmra.mrb[104].mxu1 %vm1691_vm7, %v2147_v39 }
 0x385   :  { %3564 = vmatprep.mubr.msk.bf16.mxu1 %vm3919_vm2, %v5459_v63  ;;  %3591 = vmatpush3.bf16.msra.mxu1 %v2177_v18 }
 0x386   :  { %3592 = vmatprep.subr.bf16.mxu1 %v5459_v63 }
 0x389   :  { %3593 = vmatpush3.bf16.msra.mxu1 %v2178_v48 }
 0x38a   :  { %3594 = vmatprep.subr.bf16.mxu1 %v5459_v63 }
 0x38c   :  { %3565 = vmatmul.mubr.msk.bf16.gmra.mrb[108].mxu1 %vm1691_vm7, %v2148_v51 }
 0x38d   :  { %3595 = vmatpush3.bf16.msra.mxu1 %v2667_v50  ;;  %3568 = vmatprep.mubr.msk.bf16.mxu1 %vm3919_vm2, %v5459_v63 }
 0x3b8   :  { %v2021_v21 = vpop.xlane.xlu1 %2020 }
 0x3b9   :  { %3841 = vrcp.f32 %v2021_v21 }
 0x3bc   :  { %v2006_v42 = vpop.xlane.xlu0 %2005 }
 0x3bd   :  { %3843 = vrcp.f32 %v2006_v42 }
 0x3c0   :  { %v2024_v18 = vpop.xlane.xlu0 %2023 }
 0x3c1   :  { %v2027_v4 = vpop.xlane.xlu1 %2026  ;;  %3845 = vrcp.f32 %v2024_v18 }
 0x3c2   :  { %3847 = vrcp.f32 %v2027_v4 }
 0x3c3   :  { %v3842_v11 = vpop.eup %3841 }
 0x3c4   :  { %v2039_v19 = vpop.xlane.xlu0 %2038  ;;  %v2121_v48 = vmul.f32 %v3842_v11, %v4983_v20 }
 0x3c5   :  { %3849 = vrcp.f32 %v2039_v19 }
 0x3c6   :  { %v2149_v7 = vpack.c.bf16 %v2121_v48, %v2121_v48 }
 0x3c7   :  { %v3844_v24 = vpop.eup %3843 }
 0x3c8   :  { %3569 = vmatmul.mubr.msk.bf16.gmra.mrb[112].mxu1 %vm1691_vm7, %v2149_v7  ;;  %v2116_v12 = vmul.f32 %v3844_v24, %v4998_v8 }
 0x3c9   :  { %v2042_v23 = vpop.xlane.xlu1 %2041  ;;  %3596 = vmatprep.mubr.msk.bf16.mxu1 %vm3919_vm2, %v5459_v63 }
 0x3ca   :  { %3851 = vrcp.f32 %v2042_v23  ;;  %v2146_v22 = vpack.c.bf16 %v2116_v12, %v2116_v12 }
 0x3cb   :  { %v3846_v25 = vpop.eup %3845 }
 0x3cc   :  { %v3848_v31 = vpop.eup %3847  ;;  %v2030_v27 = vpop.xlane.xlu0 %2029  ;;  %3551 = vmatmul.mubr.msk.bf16.gmra.mrb[112].mxu0 %vm1691_vm7, %v2146_v22  ;;  %v2122_v55 = vmul.f32 %v3846_v25, %v5008_v5 }
 0x3cd   :  { %3578 = vmatprep.mubr.msk.bf16.mxu0 %vm3919_vm2, %v5459_v63  ;;  %v2123_v20 = vmul.f32 %v3848_v31, %v5010_v61  ;;  %3853 = vrcp.f32 %v2030_v27 }
 0x3cf   :  { %v3850_v8 = vpop.eup %3849  ;;  %v2150_v52 = vpack.c.bf16 %v2123_v20, %v2122_v55 }
 0x3d0   :  { %v2127_v41 = vmul.f32 %v3850_v8, %v5020_v35 }
 0x3d1   :  { %v2033_v26 = vpop.xlane.xlu1 %2032 }
 0x3d2   :  { %3855 = vrcp.f32 %v2033_v26 }
 0x3d4   :  { %v3852_v14 = vpop.eup %3851  ;;  %v2045_v47 = vpop.xlane.xlu0 %2044  ;;  %3579 = vmatmul.mubr.msk.bf16.vlgmr.msra.gmra.mrb[116].mxu0 %vm1691_vm7, %v2150_v52 }
 0x3d5   :  { %v2128_v17 = vmul.f32 %v3852_v14, %v5029_v9  ;;  %v2048_v29 = vpop.xlane.xlu1 %2047  ;;  %3857 = vrcp.f32 %v2045_v47  ;;  %3582 = vmatprep.mubr.msk.bf16.mxu0 %vm3919_vm2, %v5459_v63 }
 0x3d6   :  { %3859 = vrcp.f32 %v2048_v29 }
 0x3d7   :  { %v2153_v61 = vpack.c.bf16 %v2128_v17, %v2127_v41  ;;  %v3854_v34 = vpop.eup %3853 }
 0x3d8   :  { %v2124_v45 = vmul.f32 %v3854_v34, %v5046_v3 }
 0x3d9   :  { %v2036_v5 = vpop.xlane.xlu0 %2035  ;;  %3597 = vmatmul.mubr.msk.bf16.vlgmr.msra.gmra.mrb[116].mxu1 %vm1691_vm7, %v2153_v61 }
 0x3da   :  { %3861 = vrcp.f32 %v2036_v5  ;;  %3600 = vmatprep.mubr.msk.bf16.mxu1 %vm3919_vm2, %v5459_v63 }
 0x3dc   :  { %v3856_v35 = vpop.eup %3855  ;;  %v2051_v9 = vpop.xlane.xlu1 %2050 }
 0x3dd   :  { %v2125_v49 = vmul.f32 %v3856_v35, %v5065_v43  ;;  %3863 = vrcp.f32 %v2051_v9 }
 0x3df   :  { %v2151_v40 = vpack.c.bf16 %v2125_v49, %v2124_v45  ;;  %v3858_v53 = vpop.eup %3857 }
 0x3e0   :  { %v3860_v46 = vpop.eup %3859  ;;  %v2129_v36 = vmul.f32 %v3858_v53, %v5074_v30 }
 0x3e1   :  { %3583 = vmatmul.mubr.msk.bf16.gmra.mrb[120].mxu0 %vm1691_vm7, %v2151_v40  ;;  %v2130_v54 = vmul.f32 %v3860_v46, %v5077_v58 }
 0x3e2   :  { %3586 = vmatprep.mubr.msk.bf16.mxu0 %vm3919_vm2, %v5459_v63 }
 0x3e3   :  { %v2154_v59 = vpack.c.bf16 %v2130_v54, %v2129_v36 }
 0x3e4   :  { %v3862_v32 = vpop.eup %3861 }
 0x3e5   :  { %v2126_v16 = vmul.f32 %v3862_v32, %v5084_v56  ;;  %3601 = vmatmul.mubr.msk.bf16.gmra.mrb[120].mxu1 %vm1691_vm7, %v2154_v59 }
 0x3e6   :  { %3604 = vmatprep.mubr.msk.bf16.mxu1 %vm3919_vm2, %v5459_v63 }
 0x3e7   :  { %v2152_v3 = vpack.c.bf16 %v2126_v16, %v2126_v16  ;;  %v3864_v43 = vpop.eup %3863 }
 0x3e8   :  { %v2131_v30 = vmul.f32 %v3864_v43, %v5089_v1 }
 0x3e9   :  { %3587 = vmatmul.mubr.msk.bf16.gmra.mrb[124].mxu0 %vm1691_vm7, %v2152_v3 }
 0x3ea   :  { %v2155_v44 = vpack.c.bf16 %v2131_v30, %v2131_v30 }
 0x3ed   :  { %3605 = vmatmul.mubr.msk.bf16.gmra.mrb[124].mxu1 %vm1691_vm7, %v2155_v44 }
 0x3fd   :  { %v2235_v58 = vpop.f32.mrb[60].mxu1 }
 0x3fe   :  { %2728 = vst.msk [vmem:[%s5401_s3 + $0x10] sm:$0xff] %vm2725_vm0, %v2235_v58  ;;  %v3476_v56 = vpop.f32.mrb[61].mxu1 }
 0x3ff   :  { %v2238_v28 = vpop.f32.mrb[62].mxu1 }
 0x400   :  { %2729 = vst.msk [vmem:[%s5401_s3 + $0x18] sm:$0xff] %vm2725_vm0, %v2238_v28  ;;  %v3477_v63 = vpop.f32.mrb[63].mxu1 }
 0x405   :  { %v2243_v60 = vpop.f32.mrb[64].mxu1 }
 0x406   :  { %2730 = vst.msk [vmem:[%s5401_s3 + $0x20] sm:$0xff] %vm2725_vm0, %v2243_v60  ;;  %v3480_v1 = vpop.f32.mrb[65].mxu1 }
 0x407   :  { %v2246_v33 = vpop.f32.mrb[66].mxu1 }
 0x408   :  { %v3481_v15 = vpop.f32.mrb[67].mxu1 }
 0x40e   :  { %v2295_v0 = vpop.f32.mrb[68].mxu1 }
 0x40f   :  { %2731 = vst.msk [vmem:[%s5401_s3 + $0x28] sm:$0xff] %vm2725_vm0, %v2295_v0  ;;  %v3490_v57 = vpop.f32.mrb[69].mxu1 }
 0x410   :  { %v2298_v62 = vpop.f32.mrb[70].mxu1 }
 0x411   :  { %2732 = vst.msk [vmem:[%s5401_s3 + $0x30] sm:$0xff] %vm2725_vm0, %v2298_v62  ;;  %v3491_v39 = vpop.f32.mrb[71].mxu1 }
 0x416   :  { %v2303_v38 = vpop.f32.mrb[72].mxu1 }
 0x417   :  { %2733 = vst.msk [vmem:[%s5401_s3 + $0x38] sm:$0xff] %vm2725_vm0, %v2303_v38  ;;  %v3494_v37 = vpop.f32.mrb[73].mxu1 }
 0x418   :  { %v2306_v13 = vpop.f32.mrb[74].mxu1 }
 0x419   :  { %2734 = vst.msk [vmem:[%s5401_s3 + $0x40] sm:$0xff] %vm2725_vm0, %v2306_v13  ;;  %v3495_v6 = vpop.f32.mrb[75].mxu1 }
 0x41f   :  { %v2311_v2 = vpop.f32.mrb[76].mxu1 }
 0x420   :  { %2735 = vst.msk [vmem:[%s5401_s3 + $0x48] sm:$0xff] %vm2725_vm0, %v2311_v2  ;;  %v3498_v10 = vpop.f32.mrb[77].mxu1 }
 0x421   :  { %v2314_v51 = vpop.f32.mrb[78].mxu1 }
 0x422   :  { %v3499_v50 = vpop.f32.mrb[79].mxu1 }
 0x427   :  { %v2363_v21 = vpop.f32.mrb[80].mxu1 }
 0x428   :  { %2736 = vst.msk [vmem:[%s5401_s3 + $0x50] sm:$0xff] %vm2725_vm0, %v2363_v21  ;;  %v3508_v42 = vpop.f32.mrb[81].mxu1 }
 0x429   :  { %v2366_v18 = vpop.f32.mrb[82].mxu1 }
 0x42a   :  { %2737 = vst.msk [vmem:[%s5401_s3 + $0x58] sm:$0xff] %vm2725_vm0, %v2366_v18  ;;  %v3509_v4 = vpop.f32.mrb[83].mxu1 }
 0x42f   :  { %v2371_v11 = vpop.f32.mrb[84].mxu1 }
 0x430   :  { %2738 = vst.msk [vmem:[%s5401_s3 + $0x60] sm:$0xff] %vm2725_vm0, %v2371_v11  ;;  %v3512_v19 = vpop.f32.mrb[85].mxu1 }
 0x431   :  { %v2374_v48 = vpop.f32.mrb[86].mxu1 }
 0x432   :  { %2739 = vst.msk [vmem:[%s5401_s3 + $0x68] sm:$0xff] %vm2725_vm0, %v2374_v48  ;;  %v3513_v7 = vpop.f32.mrb[87].mxu1 }
 0x437   :  { %v2379_v24 = vpop.f32.mrb[88].mxu1 }
 0x438   :  { %2740 = vst.msk [vmem:[%s5401_s3 + $0x70] sm:$0xff] %vm2725_vm0, %v2379_v24  ;;  %v3516_v23 = vpop.f32.mrb[89].mxu1 }
 0x439   :  { %v2382_v12 = vpop.f32.mrb[90].mxu1 }
 0x43a   :  { %v3517_v22 = vpop.f32.mrb[91].mxu1 }
 0x43d   :  { %v2227_v25 = vpop.f32.mrb[100].mxu0 }
 0x43e   :  { %2726 = vst.msk [vmem:[%s5401_s3] sm:$0xff] %vm2725_vm0, %v2227_v25  ;;  %v3472_v31 = vpop.f32.mrb[101].mxu0 }
 0x43f   :  { %v2431_v27 = vpop.f32.mrb[92].mxu1  ;;  %v2230_v20 = vpop.f32.mrb[102].mxu0 }
 0x440   :  { %2741 = vst.msk [vmem:[%s5401_s3 + $0x78] sm:$0xff] %vm2725_vm0, %v2431_v27  ;;  %v3526_v55 = vpop.f32.mrb[93].mxu1  ;;  %2727 = vst.msk [vmem:[%s5401_s3 + $0x8] sm:$0xff] %vm2725_vm0, %v2230_v20  ;;  %v3473_v26 = vpop.f32.mrb[103].mxu0 }
 0x441   :  { %v2434_v8 = vpop.f32.mrb[94].mxu1 }
 0x442   :  { %2742 = vst.msk [vmem:[%s5401_s3 + $0x80] sm:$0xff] %vm2725_vm0, %v2434_v8  ;;  %v3527_v52 = vpop.f32.mrb[95].mxu1 }
 0x447   :  { %v2439_v14 = vpop.f32.mrb[96].mxu1 }
 0x448   :  { %2743 = vst.msk [vmem:[%s5401_s3 + $0x88] sm:$0xff] %vm2725_vm0, %v2439_v14  ;;  %v3530_v41 = vpop.f32.mrb[97].mxu1 }
 0x449   :  { %v2442_v17 = vpop.f32.mrb[98].mxu1  ;;  %v2499_v47 = vpop.f32.mrb[104].mxu0 }
 0x44a   :  { %2744 = vst.msk [vmem:[%s5401_s3 + $0x90] sm:$0xff] %vm2725_vm0, %v2442_v17  ;;  %v3531_v29 = vpop.f32.mrb[99].mxu1  ;;  %2746 = vst.msk [vmem:[%s5401_s3 + $0xa0] sm:$0xff] %vm2725_vm0, %v2499_v47  ;;  %v3544_v61 = vpop.f32.mrb[105].mxu0 }
 0x44b   :  { %v2502_v5 = vpop.f32.mrb[106].mxu0 }
 0x44c   :  { %2747 = vst.msk [vmem:[%s5401_s3 + $0xa8] sm:$0xff] %vm2725_vm0, %v2502_v5  ;;  %v3545_v34 = vpop.f32.mrb[107].mxu0 }
 0x44f   :  { %v2447_v35 = vpop.f32.mrb[100].mxu1 }
 0x450   :  { %2745 = vst.msk [vmem:[%s5401_s3 + $0x98] sm:$0xff] %vm2725_vm0, %v2447_v35  ;;  %v3534_v9 = vpop.f32.mrb[101].mxu1 }
 0x451   :  { %v2450_v45 = vpop.f32.mrb[102].mxu1  ;;  %v2507_v49 = vpop.f32.mrb[108].mxu0 }
 0x452   :  { %v3535_v40 = vpop.f32.mrb[103].mxu1  ;;  %2748 = vst.msk [vmem:[%s5401_s3 + $0xb0] sm:$0xff] %vm2725_vm0, %v2507_v49  ;;  %v3548_v53 = vpop.f32.mrb[109].mxu0 }
 0x453   :  { %v2510_v46 = vpop.f32.mrb[110].mxu0 }
 0x454   :  { %2749 = vst.msk [vmem:[%s5401_s3 + $0xb8] sm:$0xff] %vm2725_vm0, %v2510_v46  ;;  %v3549_v36 = vpop.f32.mrb[111].mxu0 }
 0x457   :  { %v2567_v54 = vpop.f32.mrb[104].mxu1 }
 0x458   :  { %2751 = vst.msk [vmem:[%s5401_s3 + $0xc8] sm:$0xff] %vm2725_vm0, %v2567_v54  ;;  %v3562_v32 = vpop.f32.mrb[105].mxu1 }
 0x459   :  { %v2570_v59 = vpop.f32.mrb[106].mxu1 }
 0x45a   :  { %2752 = vst.msk [vmem:[%s5401_s3 + $0xd0] sm:$0xff] %vm2725_vm0, %v2570_v59  ;;  %v3563_v16 = vpop.f32.mrb[107].mxu1 }
 0x45f   :  { %v2575_v3 = vpop.f32.mrb[108].mxu1 }
 0x460   :  { %2753 = vst.msk [vmem:[%s5401_s3 + $0xd8] sm:$0xff] %vm2725_vm0, %v2575_v3  ;;  %v3566_v43 = vpop.f32.mrb[109].mxu1 }
 0x461   :  { %v2578_v30 = vpop.f32.mrb[110].mxu1 }
 0x462   :  { %2754 = vst.msk [vmem:[%s5401_s3 + $0xe0] sm:$0xff] %vm2725_vm0, %v2578_v30  ;;  %v3567_v44 = vpop.f32.mrb[111].mxu1 }
 0x49b   :  { %v2583_v58 = vpop.f32.mrb[112].mxu1 }
 0x49c   :  { %2755 = vst.msk [vmem:[%s5401_s3 + $0xe8] sm:$0xff] %vm2725_vm0, %v2583_v58  ;;  %v3570_v56 = vpop.f32.mrb[113].mxu1 }
 0x49d   :  { %v2586_v28 = vpop.f32.mrb[114].mxu1 }
 0x49e   :  { %v3571_v63 = vpop.f32.mrb[115].mxu1 }
 0x49f   :  { %v2515_v60 = vpop.f32.mrb[112].mxu0 }
 0x4a0   :  { %2750 = vst.msk [vmem:[%s5401_s3 + $0xc0] sm:$0xff] %vm2725_vm0, %v2515_v60  ;;  %v3552_v1 = vpop.f32.mrb[113].mxu0 }
 0x4a1   :  { %v2518_v33 = vpop.f32.mrb[114].mxu0 }
 0x4a2   :  { %v3553_v15 = vpop.f32.mrb[115].mxu0 }
 0x4a7   :  { %v2635_v0 = vpop.f32.mrb[116].mxu0 }
 0x4a8   :  { %2756 = vst.msk [vmem:[%s5401_s3 + $0xf0] sm:$0xff] %vm2725_vm0, %v2635_v0  ;;  %v3580_v57 = vpop.f32.mrb[117].mxu0 }
 0x4a9   :  { %v2638_v62 = vpop.f32.mrb[118].mxu0 }
 0x4aa   :  { %2757 = vst.msk [vmem:[%s5401_s3 + $0xf8] sm:$0xff] %vm2725_vm0, %v2638_v62  ;;  %v3581_v39 = vpop.f32.mrb[119].mxu0 }
 0x4ac   :  { %v2703_v38 = vpop.f32.mrb[116].mxu1 }
 0x4ad   :  { %2761 = vst.msk [vmem:[%s5401_s3 + $0x118] sm:$0xff] %vm2725_vm0, %v2703_v38  ;;  %v3598_v37 = vpop.f32.mrb[117].mxu1 }
 0x4ae   :  { %v2706_v13 = vpop.f32.mrb[118].mxu1 }
 0x4af   :  { %2762 = vst.msk [vmem:[%s5401_s3 + $0x120] sm:$0xff] %vm2725_vm0, %v2706_v13  ;;  %v3599_v6 = vpop.f32.mrb[119].mxu1 }
 0x4b4   :  { %v2643_v2 = vpop.f32.mrb[120].mxu0 }
 0x4b5   :  { %2758 = vst.msk [vmem:[%s5401_s3 + $0x100] sm:$0xff] %vm2725_vm0, %v2643_v2  ;;  %v3584_v10 = vpop.f32.mrb[121].mxu0 }
 0x4b6   :  { %v2646_v51 = vpop.f32.mrb[122].mxu0 }
 0x4b7   :  { %2759 = vst.msk [vmem:[%s5401_s3 + $0x108] sm:$0xff] %vm2725_vm0, %v2646_v51  ;;  %v3585_v50 = vpop.f32.mrb[123].mxu0 }
 0x4b8   :  { %v2711_v21 = vpop.f32.mrb[120].mxu1 }
 0x4b9   :  { %2763 = vst.msk [vmem:[%s5401_s3 + $0x128] sm:$0xff] %vm2725_vm0, %v2711_v21  ;;  %v3602_v42 = vpop.f32.mrb[121].mxu1 }
 0x4ba   :  { %v2714_v18 = vpop.f32.mrb[122].mxu1 }
 0x4bb   :  { %2764 = vst.msk [vmem:[%s5401_s3 + $0x130] sm:$0xff] %vm2725_vm0, %v2714_v18  ;;  %v3603_v4 = vpop.f32.mrb[123].mxu1 }
 0x4bc   :  { %v2651_v11 = vpop.f32.mrb[124].mxu0 }
 0x4bd   :  { %2760 = vst.msk [vmem:[%s5401_s3 + $0x110] sm:$0xff] %vm2725_vm0, %v2651_v11  ;;  %v3588_v19 = vpop.f32.mrb[125].mxu0 }
 0x4be   :  { %v2654_v48 = vpop.f32.mrb[126].mxu0 }
 0x4bf   :  { %v3589_v7 = vpop.f32.mrb[127].mxu0 }
 0x4c0   :  { %v2719_v24 = vpop.f32.mrb[124].mxu1 }
 0x4c1   :  { %2765 = vst.msk [vmem:[%s5401_s3 + $0x138] sm:$0xff] %vm2725_vm0, %v2719_v24  ;;  %v3606_v23 = vpop.f32.mrb[125].mxu1 }
 0x4c2   :  { %v2722_v12 = vpop.f32.mrb[126].mxu1 }
 0x4c3   :  { %v3607_v22 = vpop.f32.mrb[127].mxu1 }
 0x4c4   :  { %2770 = vsyncpa [#allocation3], 1 }
 0x4c5   :  { %2771 = vsyncpa [#allocation5], 1 }

</bundles_post_ra>
